<compile_context>
chip_gen: v6e
topology: v6e:2x2x1
jax: 0.10.0
libtpu: 0.0.40
codegen_flags: <defaults>
</compile_context>

<pallas_src>
import functools

import jax
import jax.numpy as jnp
from jax import lax
from jax.experimental import pallas as pl
from jax.experimental.pallas import tpu as pltpu

# ---- module hyperparameters (from the PyTorch source) ----
BLOCK_SIZE = 256
NUM_EMBED = 384
NUM_HEADS = 6
HEAD_SIZE = NUM_EMBED // NUM_HEADS  # 64


# --------------------------------------------------------------------------
# Fused kernel: one program = one (batch, q-row-tile).
#   Q/K/V = x @ W_{q,k,v,all}   (full-width 384-wide matmuls, bf16-in/f32-acc)
#   per head: s = q_h k_h^T * C^-0.5, causal mask, softmax, o_h = softmax(s) v_h
#   y = concat(o_h) @ W_proj + b   (fused output projection)
# --------------------------------------------------------------------------
def _mha_fused_kernel(x_ref, wq_ref, wk_ref, wv_ref, wp_ref, bp_ref,
                      o_ref, cat_ref, *, num_heads):
    T = x_ref.shape[1]
    C = x_ref.shape[2]
    tq = o_ref.shape[1]
    HC = wq_ref.shape[1]
    hs = HC // num_heads

    # bf16 MXU operands, f32 accumulation.  Weights arrive already bf16.
    x_all = x_ref[0].astype(jnp.bfloat16)                       # (T, C) -> K, V

    if tq == T:                                                  # nq == 1
        row_off = 0
        x_q = x_all                                              # (tq, C) == (T, C)
    else:
        row_off = pl.multiple_of(pl.program_id(1) * tq, tq)
        x_q = x_ref[0, pl.ds(row_off, tq), :].astype(jnp.bfloat16)

    # Fused full-width QKV projections; fold the (C ** -0.5) scale into q.
    scale = jnp.float32(C) ** -0.5        # NB: scales by C = num_embed, like the torch code
    q = jnp.dot(x_q, wq_ref[...], preferred_element_type=jnp.float32) * scale  # (tq, HC)
    k = jnp.dot(x_all, wk_ref[...], preferred_element_type=jnp.float32)        # (T, HC)
    v = jnp.dot(x_all, wv_ref[...], preferred_element_type=jnp.float32)        # (T, HC)
    q_bf = q.astype(jnp.bfloat16)
    k_bf = k.astype(jnp.bfloat16)
    v_bf = v.astype(jnp.bfloat16)

    # Causal mask for this q tile: global query row >= key column.
    row = row_off + lax.broadcasted_iota(jnp.int32, (tq, T), 0)
    col = lax.broadcasted_iota(jnp.int32, (tq, T), 1)
    causal = row >= col
    neg_inf = jnp.float32(-jnp.inf)

    for h in range(num_heads):                     # static, unrolled (H = 6)
        lo, hi = h * hs, (h + 1) * hs
        # q_h @ k_h^T without materializing k.T (contract the hs axis of both).
        s = lax.dot_general(
            q_bf[:, lo:hi], k_bf[:, lo:hi],
            dimension_numbers=(((1,), (1,)), ((), ())),
            preferred_element_type=jnp.float32)    # (tq, T)
        s = jnp.where(causal, s, neg_inf)

        # softmax over the last axis in f32; normalize AFTER the PV matmul
        # (flash-style) so only a (tq, hs) tile is scaled, not a (tq, T) one.
        m = jnp.max(s, axis=-1, keepdims=True)
        p = jnp.exp(s - m)                         # unnormalized probs, <= 1
        denom = jnp.sum(p, axis=-1, keepdims=True)
        o_h = jnp.dot(p.astype(jnp.bfloat16), v_bf[:, lo:hi],
                      preferred_element_type=jnp.float32)        # (tq, hs)
        o_h = o_h * pl.reciprocal(denom, approx=True)            # EUP slot

        # store each head as it is produced -> bounds live ranges, bf16 relayout
        cat_ref[:, lo:hi] = o_h.astype(jnp.bfloat16)

    # Fused output projection.
    y = jnp.dot(cat_ref[...], wp_ref[...],
                preferred_element_type=jnp.float32) + bp_ref[...]  # (tq, C)

    # TODO(synk): training-mode dropout (attention weights + projection output)
    # not implemented -- eval-mode forward only.
    o_ref[0] = y.astype(o_ref.dtype)


@jax.jit
def multi_head_attention(x, wq, wk, wv, w_proj, b_proj):
    """x: (B, T, C); wq/wk/wv: (H, C, hs); w_proj: (C, C); b_proj: (C,)."""
    B, T, C = x.shape
    H, _, hs = wq.shape
    HC = H * hs

    # Stack per-head weights into lane-dense (C, H*hs): head h owns columns
    # [h*hs, (h+1)*hs), so the in-kernel concat order matches torch.cat(heads).
    # Pre-cast to bf16 (bit-identical to the cast previously done in-kernel):
    # halves weight DMA bytes and resident VMEM.
    wq_all = jnp.transpose(wq, (1, 0, 2)).reshape(C, HC).astype(jnp.bfloat16)
    wk_all = jnp.transpose(wk, (1, 0, 2)).reshape(C, HC).astype(jnp.bfloat16)
    wv_all = jnp.transpose(wv, (1, 0, 2)).reshape(C, HC).astype(jnp.bfloat16)
    wp_bf = w_proj.astype(jnp.bfloat16)
    bias = b_proj.reshape(1, C).astype(jnp.float32)

    # q-row tiling: keep a single tile (tq = T, grid=(B,)) whenever B >= 2 so
    # K/V are projected exactly once per batch program.  Split q rows only when
    # B == 1 and T is large, so v7x's second TensorCore still gets work.
    if B == 1 and T > 128 and T % 128 == 0:
        tq = 128
    else:
        tq = T
    nq = T // tq

    flops = int(B * nq * (2 * tq * C * HC              # Q projection
                          + 2 * 2 * T * C * HC         # K, V projections
                          + 2 * H * tq * T * 2 * hs    # scores + PV
                          + 2 * tq * C * C))           # output projection
    transcendentals = int(B * nq * H * tq * T)         # softmax exp
    bytes_accessed = int(B * nq * T * C * 4            # x block per program (f32)
                         + (3 * C * HC + C * C) * 2    # bf16 weights
                         + C * 4                       # bias
                         + B * T * C * 4)              # output (f32)

    kernel = functools.partial(_mha_fused_kernel, num_heads=H)
    out = pl.pallas_call(
        kernel,
        out_shape=jax.ShapeDtypeStruct((B, T, C), x.dtype),
        grid_spec=pltpu.PrefetchScalarGridSpec(
            num_scalar_prefetch=0,
            grid=(B, nq),
            in_specs=[
                pl.BlockSpec((1, T, C), lambda b, qi: (b, 0, 0)),   # x: full seq (Q/K/V)
                pl.BlockSpec((C, HC), lambda b, qi: (0, 0)),        # Wq (resident)
                pl.BlockSpec((C, HC), lambda b, qi: (0, 0)),        # Wk (resident)
                pl.BlockSpec((C, HC), lambda b, qi: (0, 0)),        # Wv (resident)
                pl.BlockSpec((C, C), lambda b, qi: (0, 0)),         # W_proj (resident)
                pl.BlockSpec((1, C), lambda b, qi: (0, 0)),         # bias
            ],
            out_specs=pl.BlockSpec((1, tq, C), lambda b, qi: (b, qi, 0)),
            scratch_shapes=[pltpu.VMEM((tq, HC), jnp.bfloat16)],    # head concat
        ),
        compiler_params=pltpu.CompilerParams(
            dimension_semantics=("parallel", "parallel"),
            vmem_limit_bytes=32 * 1024 * 1024),   # headroom for v5e at T=256
        cost_estimate=pl.CostEstimate(
            flops=flops, transcendentals=transcendentals,
            bytes_accessed=bytes_accessed),
    )(x, wq_all, wk_all, wv_all, wp_bf, bias)

    return out


def _reference(x, wq, wk, wv, w_proj, b_proj):
    """Pure-JAX f32 reference matching the PyTorch forward (eval mode)."""
    B, T, C = x.shape
    outs = []
    for h in range(wq.shape[0]):
        q = x @ wq[h]
        k = x @ wk[h]
        v = x @ wv[h]
        s = (q @ jnp.swapaxes(k, -2, -1)) * (C ** -0.5)
        mask = jnp.tril(jnp.ones((T, T), dtype=bool))
        s = jnp.where(mask, s, -jnp.inf)
        w = jax.nn.softmax(s, axis=-1)
        outs.append(w @ v)
    cat = jnp.concatenate(outs, axis=-1)
    return cat @ w_proj + b_proj


if __name__ == "__main__":
    key = jax.random.PRNGKey(0)
    B, T = 2, 8  # T <= block_size
    C, H, hs = NUM_EMBED, NUM_HEADS, HEAD_SIZE

    k0, k1, k2, k3, k4, k5 = jax.random.split(key, 6)
    x = jax.random.normal(k0, (B, T, C), dtype=jnp.float32)
    wq = jax.random.normal(k1, (H, C, hs), dtype=jnp.float32) * 0.02
    wk = jax.random.normal(k2, (H, C, hs), dtype=jnp.float32) * 0.02
    wv = jax.random.normal(k3, (H, C, hs), dtype=jnp.float32) * 0.02
    w_proj = jax.random.normal(k4, (C, C), dtype=jnp.float32) * 0.02
    b_proj = jax.random.normal(k5, (C,), dtype=jnp.float32) * 0.02

    out = multi_head_attention(x, wq, wk, wv, w_proj, b_proj)
    out = jax.block_until_ready(out)

    ref = _reference(x, wq, wk, wv, w_proj, b_proj)
    assert out.shape == (B, T, C)
    # Tolerance reflects bf16 matmul operands (f32 accumulation) + approx
    # reciprocal in the softmax normalization; observed error is ~1e-3.
    assert jnp.allclose(out, ref, atol=3e-2, rtol=3e-2), "mismatch vs reference"

    print("KERNEL_OK")
</pallas_src>

<mosaic_0001>
module attributes {stable_mosaic.version = 11 : i64} {
  func.func @_mha_fused_kernel(%arg0: i32, %arg1: i32, %arg2: memref<1x8x384xf32, #tpu.memory_space<vmem>>, %arg3: memref<384x384xbf16, #tpu.memory_space<vmem>>, %arg4: memref<384x384xbf16, #tpu.memory_space<vmem>>, %arg5: memref<384x384xbf16, #tpu.memory_space<vmem>>, %arg6: memref<384x384xbf16, #tpu.memory_space<vmem>>, %arg7: memref<1x384xf32, #tpu.memory_space<vmem>>, %arg8: memref<1x8x384xf32, #tpu.memory_space<vmem>>, %arg9: memref<8x384xbf16, #tpu.memory_space<vmem>>) attributes {dimension_semantics = [#tpu.dimension_semantics<parallel>, #tpu.dimension_semantics<parallel>], iteration_bounds = array<i64: 2, 1>, scalar_prefetch = 0 : i64, scratch_operands = 1 : i64, tpu.core_type = #tpu.core_type<tc>, window_params = [{transform_indices = @transform_0, window_bounds = array<i64: 1, 8, 384>}, {pipeline_mode = #tpu.pipeline_mode<synchronous>, transform_indices = @transform_1, window_bounds = array<i64: 384, 384>}, {pipeline_mode = #tpu.pipeline_mode<synchronous>, transform_indices = @transform_2, window_bounds = array<i64: 384, 384>}, {pipeline_mode = #tpu.pipeline_mode<synchronous>, transform_indices = @transform_3, window_bounds = array<i64: 384, 384>}, {pipeline_mode = #tpu.pipeline_mode<synchronous>, transform_indices = @transform_4, window_bounds = array<i64: 384, 384>}, {pipeline_mode = #tpu.pipeline_mode<synchronous>, transform_indices = @transform_5, window_bounds = array<i64: 1, 384>}, {transform_indices = @transform_6, window_bounds = array<i64: 1, 8, 384>}]} {
    %c0 = arith.constant 0 : index
    %c0_0 = arith.constant 0 : index
    %c0_1 = arith.constant 0 : index
    %0 = vector.load %arg2[%c0, %c0_0, %c0_1] : memref<1x8x384xf32, #tpu.memory_space<vmem>>, vector<1x8x384xf32>
    %1 = vector.shape_cast %0 : vector<1x8x384xf32> to vector<8x384xf32>
    %2 = arith.truncf %1 : vector<8x384xf32> to vector<8x384xbf16>
    %cst = arith.constant 3.840000e+02 : f32
    %cst_2 = arith.constant -5.000000e-01 : f32
    %3 = math.powf %cst, %cst_2 : f32
    %c0_3 = arith.constant 0 : index
    %c0_4 = arith.constant 0 : index
    %4 = vector.load %arg3[%c0_3, %c0_4] : memref<384x384xbf16, #tpu.memory_space<vmem>>, vector<384x384xbf16>
    %cst_5 = arith.constant dense<0.000000e+00> : vector<8x384xf32>
    %5 = tpu.matmul %2, %4, %cst_5 {dimension_numbers = #tpu.dot_dimension_numbers<[1], [0], [0], [1], [0, 0, 1, 1], [], []>} : vector<8x384xbf16>, vector<384x384xbf16>, vector<8x384xf32> -> vector<8x384xf32>
    %6 = vector.broadcast %3 : f32 to vector<8x384xf32>
    %7 = arith.mulf %5, %6 : vector<8x384xf32>
    %c0_6 = arith.constant 0 : index
    %c0_7 = arith.constant 0 : index
    %8 = vector.load %arg4[%c0_6, %c0_7] : memref<384x384xbf16, #tpu.memory_space<vmem>>, vector<384x384xbf16>
    %cst_8 = arith.constant dense<0.000000e+00> : vector<8x384xf32>
    %9 = tpu.matmul %2, %8, %cst_8 {dimension_numbers = #tpu.dot_dimension_numbers<[1], [0], [0], [1], [0, 0, 1, 1], [], []>} : vector<8x384xbf16>, vector<384x384xbf16>, vector<8x384xf32> -> vector<8x384xf32>
    %c0_9 = arith.constant 0 : index
    %c0_10 = arith.constant 0 : index
    %10 = vector.load %arg5[%c0_9, %c0_10] : memref<384x384xbf16, #tpu.memory_space<vmem>>, vector<384x384xbf16>
    %cst_11 = arith.constant dense<0.000000e+00> : vector<8x384xf32>
    %11 = tpu.matmul %2, %10, %cst_11 {dimension_numbers = #tpu.dot_dimension_numbers<[1], [0], [0], [1], [0, 0, 1, 1], [], []>} : vector<8x384xbf16>, vector<384x384xbf16>, vector<8x384xf32> -> vector<8x384xf32>
    %12 = arith.truncf %7 : vector<8x384xf32> to vector<8x384xbf16>
    %13 = arith.truncf %9 : vector<8x384xf32> to vector<8x384xbf16>
    %14 = arith.truncf %11 : vector<8x384xf32> to vector<8x384xbf16>
    %15 = tpu.iota {dimensions = array<i32: 0>} : vector<8x8xi32>
    %c0_i32 = arith.constant 0 : i32
    %16 = vector.broadcast %c0_i32 : i32 to vector<8x8xi32>
    %17 = arith.addi %16, %15 : vector<8x8xi32>
    %18 = tpu.iota {dimensions = array<i32: 1>} : vector<8x8xi32>
    %19 = arith.cmpi sge, %17, %18 : vector<8x8xi32>
    %20 = vector.extract_strided_slice %12 {offsets = [0, 0], sizes = [8, 64], strides = [1, 1]} : vector<8x384xbf16> to vector<8x64xbf16>
    %21 = vector.extract_strided_slice %13 {offsets = [0, 0], sizes = [8, 64], strides = [1, 1]} : vector<8x384xbf16> to vector<8x64xbf16>
    %cst_12 = arith.constant dense<0.000000e+00> : vector<8x8xf32>
    %22 = tpu.matmul %20, %21, %cst_12 {dimension_numbers = #tpu.dot_dimension_numbers<[1], [1], [0], [0], [0, 0, 1, 0], [], []>} : vector<8x64xbf16>, vector<8x64xbf16>, vector<8x8xf32> -> vector<8x8xf32>
    %cst_13 = arith.constant 0xFF800000 : f32
    %23 = vector.broadcast %cst_13 : f32 to vector<8x8xf32>
    %24 = arith.select %19, %22, %23 : vector<8x8xi1>, vector<8x8xf32>
    %cst_14 = arith.constant dense<0xFF800000> : vector<8xf32>
    %25 = vector.multi_reduction <maximumf>, %24, %cst_14 [1] : vector<8x8xf32> to vector<8xf32>
    %26 = vector.shape_cast %25 : vector<8xf32> to vector<8x1xf32>
    %27 = vector.broadcast %26 : vector<8x1xf32> to vector<8x8xf32>
    %28 = arith.subf %24, %27 : vector<8x8xf32>
    %29 = math.exp %28 : vector<8x8xf32>
    %cst_15 = arith.constant dense<0.000000e+00> : vector<8xf32>
    %30 = vector.multi_reduction <add>, %29, %cst_15 [1] : vector<8x8xf32> to vector<8xf32>
    %31 = vector.shape_cast %30 : vector<8xf32> to vector<8x1xf32>
    %32 = arith.truncf %29 : vector<8x8xf32> to vector<8x8xbf16>
    %33 = vector.extract_strided_slice %14 {offsets = [0, 0], sizes = [8, 64], strides = [1, 1]} : vector<8x384xbf16> to vector<8x64xbf16>
    %cst_16 = arith.constant dense<0.000000e+00> : vector<8x64xf32>
    %34 = tpu.matmul %32, %33, %cst_16 {dimension_numbers = #tpu.dot_dimension_numbers<[1], [0], [0], [1], [0, 0, 1, 1], [], []>} : vector<8x8xbf16>, vector<8x64xbf16>, vector<8x64xf32> -> vector<8x64xf32>
    %35 = tpu.reciprocal %31 {approx = true} : vector<8x1xf32> -> vector<8x1xf32>
    %36 = vector.broadcast %35 : vector<8x1xf32> to vector<8x64xf32>
    %37 = arith.mulf %34, %36 : vector<8x64xf32>
    %38 = arith.truncf %37 : vector<8x64xf32> to vector<8x64xbf16>
    %c0_17 = arith.constant 0 : index
    %c0_18 = arith.constant 0 : index
    %39 = vector.load %arg9[%c0_17, %c0_18] : memref<8x384xbf16, #tpu.memory_space<vmem>>, vector<8x64xbf16>
    tpu.vector_store %arg9[%c0_17, %c0_18], %38 {strides = array<i32>} : memref<8x384xbf16, #tpu.memory_space<vmem>>, vector<8x64xbf16>,
    %40 = vector.extract_strided_slice %12 {offsets = [0, 64], sizes = [8, 64], strides = [1, 1]} : vector<8x384xbf16> to vector<8x64xbf16>
    %41 = vector.extract_strided_slice %13 {offsets = [0, 64], sizes = [8, 64], strides = [1, 1]} : vector<8x384xbf16> to vector<8x64xbf16>
    %cst_19 = arith.constant dense<0.000000e+00> : vector<8x8xf32>
    %42 = tpu.matmul %40, %41, %cst_19 {dimension_numbers = #tpu.dot_dimension_numbers<[1], [1], [0], [0], [0, 0, 1, 0], [], []>} : vector<8x64xbf16>, vector<8x64xbf16>, vector<8x8xf32> -> vector<8x8xf32>
    %cst_20 = arith.constant 0xFF800000 : f32
    %43 = vector.broadcast %cst_20 : f32 to vector<8x8xf32>
    %44 = arith.select %19, %42, %43 : vector<8x8xi1>, vector<8x8xf32>
    %cst_21 = arith.constant dense<0xFF800000> : vector<8xf32>
    %45 = vector.multi_reduction <maximumf>, %44, %cst_21 [1] : vector<8x8xf32> to vector<8xf32>
    %46 = vector.shape_cast %45 : vector<8xf32> to vector<8x1xf32>
    %47 = vector.broadcast %46 : vector<8x1xf32> to vector<8x8xf32>
    %48 = arith.subf %44, %47 : vector<8x8xf32>
    %49 = math.exp %48 : vector<8x8xf32>
    %cst_22 = arith.constant dense<0.000000e+00> : vector<8xf32>
    %50 = vector.multi_reduction <add>, %49, %cst_22 [1] : vector<8x8xf32> to vector<8xf32>
    %51 = vector.shape_cast %50 : vector<8xf32> to vector<8x1xf32>
    %52 = arith.truncf %49 : vector<8x8xf32> to vector<8x8xbf16>
    %53 = vector.extract_strided_slice %14 {offsets = [0, 64], sizes = [8, 64], strides = [1, 1]} : vector<8x384xbf16> to vector<8x64xbf16>
    %cst_23 = arith.constant dense<0.000000e+00> : vector<8x64xf32>
    %54 = tpu.matmul %52, %53, %cst_23 {dimension_numbers = #tpu.dot_dimension_numbers<[1], [0], [0], [1], [0, 0, 1, 1], [], []>} : vector<8x8xbf16>, vector<8x64xbf16>, vector<8x64xf32> -> vector<8x64xf32>
    %55 = tpu.reciprocal %51 {approx = true} : vector<8x1xf32> -> vector<8x1xf32>
    %56 = vector.broadcast %55 : vector<8x1xf32> to vector<8x64xf32>
    %57 = arith.mulf %54, %56 : vector<8x64xf32>
    %58 = arith.truncf %57 : vector<8x64xf32> to vector<8x64xbf16>
    %c0_24 = arith.constant 0 : index
    %c64 = arith.constant 64 : index
    %59 = vector.load %arg9[%c0_24, %c64] : memref<8x384xbf16, #tpu.memory_space<vmem>>, vector<8x64xbf16>
    tpu.vector_store %arg9[%c0_24, %c64], %58 {strides = array<i32>} : memref<8x384xbf16, #tpu.memory_space<vmem>>, vector<8x64xbf16>,
    %60 = vector.extract_strided_slice %12 {offsets = [0, 128], sizes = [8, 64], strides = [1, 1]} : vector<8x384xbf16> to vector<8x64xbf16>
    %61 = vector.extract_strided_slice %13 {offsets = [0, 128], sizes = [8, 64], strides = [1, 1]} : vector<8x384xbf16> to vector<8x64xbf16>
    %cst_25 = arith.constant dense<0.000000e+00> : vector<8x8xf32>
    %62 = tpu.matmul %60, %61, %cst_25 {dimension_numbers = #tpu.dot_dimension_numbers<[1], [1], [0], [0], [0, 0, 1, 0], [], []>} : vector<8x64xbf16>, vector<8x64xbf16>, vector<8x8xf32> -> vector<8x8xf32>
    %cst_26 = arith.constant 0xFF800000 : f32
    %63 = vector.broadcast %cst_26 : f32 to vector<8x8xf32>
    %64 = arith.select %19, %62, %63 : vector<8x8xi1>, vector<8x8xf32>
    %cst_27 = arith.constant dense<0xFF800000> : vector<8xf32>
    %65 = vector.multi_reduction <maximumf>, %64, %cst_27 [1] : vector<8x8xf32> to vector<8xf32>
    %66 = vector.shape_cast %65 : vector<8xf32> to vector<8x1xf32>
    %67 = vector.broadcast %66 : vector<8x1xf32> to vector<8x8xf32>
    %68 = arith.subf %64, %67 : vector<8x8xf32>
    %69 = math.exp %68 : vector<8x8xf32>
    %cst_28 = arith.constant dense<0.000000e+00> : vector<8xf32>
    %70 = vector.multi_reduction <add>, %69, %cst_28 [1] : vector<8x8xf32> to vector<8xf32>
    %71 = vector.shape_cast %70 : vector<8xf32> to vector<8x1xf32>
    %72 = arith.truncf %69 : vector<8x8xf32> to vector<8x8xbf16>
    %73 = vector.extract_strided_slice %14 {offsets = [0, 128], sizes = [8, 64], strides = [1, 1]} : vector<8x384xbf16> to vector<8x64xbf16>
    %cst_29 = arith.constant dense<0.000000e+00> : vector<8x64xf32>
    %74 = tpu.matmul %72, %73, %cst_29 {dimension_numbers = #tpu.dot_dimension_numbers<[1], [0], [0], [1], [0, 0, 1, 1], [], []>} : vector<8x8xbf16>, vector<8x64xbf16>, vector<8x64xf32> -> vector<8x64xf32>
    %75 = tpu.reciprocal %71 {approx = true} : vector<8x1xf32> -> vector<8x1xf32>
    %76 = vector.broadcast %75 : vector<8x1xf32> to vector<8x64xf32>
    %77 = arith.mulf %74, %76 : vector<8x64xf32>
    %78 = arith.truncf %77 : vector<8x64xf32> to vector<8x64xbf16>
    %c0_30 = arith.constant 0 : index
    %c128 = arith.constant 128 : index
    %79 = vector.load %arg9[%c0_30, %c128] : memref<8x384xbf16, #tpu.memory_space<vmem>>, vector<8x64xbf16>
    tpu.vector_store %arg9[%c0_30, %c128], %78 {strides = array<i32>} : memref<8x384xbf16, #tpu.memory_space<vmem>>, vector<8x64xbf16>,
    %80 = vector.extract_strided_slice %12 {offsets = [0, 192], sizes = [8, 64], strides = [1, 1]} : vector<8x384xbf16> to vector<8x64xbf16>
    %81 = vector.extract_strided_slice %13 {offsets = [0, 192], sizes = [8, 64], strides = [1, 1]} : vector<8x384xbf16> to vector<8x64xbf16>
    %cst_31 = arith.constant dense<0.000000e+00> : vector<8x8xf32>
    %82 = tpu.matmul %80, %81, %cst_31 {dimension_numbers = #tpu.dot_dimension_numbers<[1], [1], [0], [0], [0, 0, 1, 0], [], []>} : vector<8x64xbf16>, vector<8x64xbf16>, vector<8x8xf32> -> vector<8x8xf32>
    %cst_32 = arith.constant 0xFF800000 : f32
    %83 = vector.broadcast %cst_32 : f32 to vector<8x8xf32>
    %84 = arith.select %19, %82, %83 : vector<8x8xi1>, vector<8x8xf32>
    %cst_33 = arith.constant dense<0xFF800000> : vector<8xf32>
    %85 = vector.multi_reduction <maximumf>, %84, %cst_33 [1] : vector<8x8xf32> to vector<8xf32>
    %86 = vector.shape_cast %85 : vector<8xf32> to vector<8x1xf32>
    %87 = vector.broadcast %86 : vector<8x1xf32> to vector<8x8xf32>
    %88 = arith.subf %84, %87 : vector<8x8xf32>
    %89 = math.exp %88 : vector<8x8xf32>
    %cst_34 = arith.constant dense<0.000000e+00> : vector<8xf32>
    %90 = vector.multi_reduction <add>, %89, %cst_34 [1] : vector<8x8xf32> to vector<8xf32>
    %91 = vector.shape_cast %90 : vector<8xf32> to vector<8x1xf32>
    %92 = arith.truncf %89 : vector<8x8xf32> to vector<8x8xbf16>
    %93 = vector.extract_strided_slice %14 {offsets = [0, 192], sizes = [8, 64], strides = [1, 1]} : vector<8x384xbf16> to vector<8x64xbf16>
    %cst_35 = arith.constant dense<0.000000e+00> : vector<8x64xf32>
    %94 = tpu.matmul %92, %93, %cst_35 {dimension_numbers = #tpu.dot_dimension_numbers<[1], [0], [0], [1], [0, 0, 1, 1], [], []>} : vector<8x8xbf16>, vector<8x64xbf16>, vector<8x64xf32> -> vector<8x64xf32>
    %95 = tpu.reciprocal %91 {approx = true} : vector<8x1xf32> -> vector<8x1xf32>
    %96 = vector.broadcast %95 : vector<8x1xf32> to vector<8x64xf32>
    %97 = arith.mulf %94, %96 : vector<8x64xf32>
    %98 = arith.truncf %97 : vector<8x64xf32> to vector<8x64xbf16>
    %c0_36 = arith.constant 0 : index
    %c192 = arith.constant 192 : index
    %99 = vector.load %arg9[%c0_36, %c192] : memref<8x384xbf16, #tpu.memory_space<vmem>>, vector<8x64xbf16>
    tpu.vector_store %arg9[%c0_36, %c192], %98 {strides = array<i32>} : memref<8x384xbf16, #tpu.memory_space<vmem>>, vector<8x64xbf16>,
    %100 = vector.extract_strided_slice %12 {offsets = [0, 256], sizes = [8, 64], strides = [1, 1]} : vector<8x384xbf16> to vector<8x64xbf16>
    %101 = vector.extract_strided_slice %13 {offsets = [0, 256], sizes = [8, 64], strides = [1, 1]} : vector<8x384xbf16> to vector<8x64xbf16>
    %cst_37 = arith.constant dense<0.000000e+00> : vector<8x8xf32>
    %102 = tpu.matmul %100, %101, %cst_37 {dimension_numbers = #tpu.dot_dimension_numbers<[1], [1], [0], [0], [0, 0, 1, 0], [], []>} : vector<8x64xbf16>, vector<8x64xbf16>, vector<8x8xf32> -> vector<8x8xf32>
    %cst_38 = arith.constant 0xFF800000 : f32
    %103 = vector.broadcast %cst_38 : f32 to vector<8x8xf32>
    %104 = arith.select %19, %102, %103 : vector<8x8xi1>, vector<8x8xf32>
    %cst_39 = arith.constant dense<0xFF800000> : vector<8xf32>
    %105 = vector.multi_reduction <maximumf>, %104, %cst_39 [1] : vector<8x8xf32> to vector<8xf32>
    %106 = vector.shape_cast %105 : vector<8xf32> to vector<8x1xf32>
    %107 = vector.broadcast %106 : vector<8x1xf32> to vector<8x8xf32>
    %108 = arith.subf %104, %107 : vector<8x8xf32>
    %109 = math.exp %108 : vector<8x8xf32>
    %cst_40 = arith.constant dense<0.000000e+00> : vector<8xf32>
    %110 = vector.multi_reduction <add>, %109, %cst_40 [1] : vector<8x8xf32> to vector<8xf32>
    %111 = vector.shape_cast %110 : vector<8xf32> to vector<8x1xf32>
    %112 = arith.truncf %109 : vector<8x8xf32> to vector<8x8xbf16>
    %113 = vector.extract_strided_slice %14 {offsets = [0, 256], sizes = [8, 64], strides = [1, 1]} : vector<8x384xbf16> to vector<8x64xbf16>
    %cst_41 = arith.constant dense<0.000000e+00> : vector<8x64xf32>
    %114 = tpu.matmul %112, %113, %cst_41 {dimension_numbers = #tpu.dot_dimension_numbers<[1], [0], [0], [1], [0, 0, 1, 1], [], []>} : vector<8x8xbf16>, vector<8x64xbf16>, vector<8x64xf32> -> vector<8x64xf32>
    %115 = tpu.reciprocal %111 {approx = true} : vector<8x1xf32> -> vector<8x1xf32>
    %116 = vector.broadcast %115 : vector<8x1xf32> to vector<8x64xf32>
    %117 = arith.mulf %114, %116 : vector<8x64xf32>
    %118 = arith.truncf %117 : vector<8x64xf32> to vector<8x64xbf16>
    %c0_42 = arith.constant 0 : index
    %c256 = arith.constant 256 : index
    %119 = vector.load %arg9[%c0_42, %c256] : memref<8x384xbf16, #tpu.memory_space<vmem>>, vector<8x64xbf16>
    tpu.vector_store %arg9[%c0_42, %c256], %118 {strides = array<i32>} : memref<8x384xbf16, #tpu.memory_space<vmem>>, vector<8x64xbf16>,
    %120 = vector.extract_strided_slice %12 {offsets = [0, 320], sizes = [8, 64], strides = [1, 1]} : vector<8x384xbf16> to vector<8x64xbf16>
    %121 = vector.extract_strided_slice %13 {offsets = [0, 320], sizes = [8, 64], strides = [1, 1]} : vector<8x384xbf16> to vector<8x64xbf16>
    %cst_43 = arith.constant dense<0.000000e+00> : vector<8x8xf32>
    %122 = tpu.matmul %120, %121, %cst_43 {dimension_numbers = #tpu.dot_dimension_numbers<[1], [1], [0], [0], [0, 0, 1, 0], [], []>} : vector<8x64xbf16>, vector<8x64xbf16>, vector<8x8xf32> -> vector<8x8xf32>
    %cst_44 = arith.constant 0xFF800000 : f32
    %123 = vector.broadcast %cst_44 : f32 to vector<8x8xf32>
    %124 = arith.select %19, %122, %123 : vector<8x8xi1>, vector<8x8xf32>
    %cst_45 = arith.constant dense<0xFF800000> : vector<8xf32>
    %125 = vector.multi_reduction <maximumf>, %124, %cst_45 [1] : vector<8x8xf32> to vector<8xf32>
    %126 = vector.shape_cast %125 : vector<8xf32> to vector<8x1xf32>
    %127 = vector.broadcast %126 : vector<8x1xf32> to vector<8x8xf32>
    %128 = arith.subf %124, %127 : vector<8x8xf32>
    %129 = math.exp %128 : vector<8x8xf32>
    %cst_46 = arith.constant dense<0.000000e+00> : vector<8xf32>
    %130 = vector.multi_reduction <add>, %129, %cst_46 [1] : vector<8x8xf32> to vector<8xf32>
    %131 = vector.shape_cast %130 : vector<8xf32> to vector<8x1xf32>
    %132 = arith.truncf %129 : vector<8x8xf32> to vector<8x8xbf16>
    %133 = vector.extract_strided_slice %14 {offsets = [0, 320], sizes = [8, 64], strides = [1, 1]} : vector<8x384xbf16> to vector<8x64xbf16>
    %cst_47 = arith.constant dense<0.000000e+00> : vector<8x64xf32>
    %134 = tpu.matmul %132, %133, %cst_47 {dimension_numbers = #tpu.dot_dimension_numbers<[1], [0], [0], [1], [0, 0, 1, 1], [], []>} : vector<8x8xbf16>, vector<8x64xbf16>, vector<8x64xf32> -> vector<8x64xf32>
    %135 = tpu.reciprocal %131 {approx = true} : vector<8x1xf32> -> vector<8x1xf32>
    %136 = vector.broadcast %135 : vector<8x1xf32> to vector<8x64xf32>
    %137 = arith.mulf %134, %136 : vector<8x64xf32>
    %138 = arith.truncf %137 : vector<8x64xf32> to vector<8x64xbf16>
    %c0_48 = arith.constant 0 : index
    %c320 = arith.constant 320 : index
    %139 = vector.load %arg9[%c0_48, %c320] : memref<8x384xbf16, #tpu.memory_space<vmem>>, vector<8x64xbf16>
    tpu.vector_store %arg9[%c0_48, %c320], %138 {strides = array<i32>} : memref<8x384xbf16, #tpu.memory_space<vmem>>, vector<8x64xbf16>,
    %c0_49 = arith.constant 0 : index
    %c0_50 = arith.constant 0 : index
    %140 = vector.load %arg9[%c0_49, %c0_50] : memref<8x384xbf16, #tpu.memory_space<vmem>>, vector<8x384xbf16>
    %c0_51 = arith.constant 0 : index
    %c0_52 = arith.constant 0 : index
    %141 = vector.load %arg6[%c0_51, %c0_52] : memref<384x384xbf16, #tpu.memory_space<vmem>>, vector<384x384xbf16>
    %cst_53 = arith.constant dense<0.000000e+00> : vector<8x384xf32>
    %142 = tpu.matmul %140, %141, %cst_53 {dimension_numbers = #tpu.dot_dimension_numbers<[1], [0], [0], [1], [0, 0, 1, 1], [], []>} : vector<8x384xbf16>, vector<384x384xbf16>, vector<8x384xf32> -> vector<8x384xf32>
    %c0_54 = arith.constant 0 : index
    %c0_55 = arith.constant 0 : index
    %143 = vector.load %arg7[%c0_54, %c0_55] : memref<1x384xf32, #tpu.memory_space<vmem>>, vector<1x384xf32>
    %144 = vector.broadcast %143 : vector<1x384xf32> to vector<8x384xf32>
    %145 = arith.addf %142, %144 : vector<8x384xf32>
    %c0_56 = arith.constant 0 : index
    %c0_57 = arith.constant 0 : index
    %c0_58 = arith.constant 0 : index
    %146 = vector.load %arg8[%c0_56, %c0_57, %c0_58] : memref<1x8x384xf32, #tpu.memory_space<vmem>>, vector<1x8x384xf32>
    %147 = vector.shape_cast %146 : vector<1x8x384xf32> to vector<8x384xf32>
    %148 = vector.shape_cast %145 : vector<8x384xf32> to vector<1x8x384xf32>
    tpu.vector_store %arg8[%c0_56, %c0_57, %c0_58], %148 {strides = array<i32>} : memref<1x8x384xf32, #tpu.memory_space<vmem>>, vector<1x8x384xf32>,
    return
  }
  func.func @transform_0(%arg0: i32, %arg1: i32) -> (i32, i32, i32) {
    %c0_i32 = arith.constant 0 : i32
    %c0_i32_0 = arith.constant 0 : i32
    %c0_i32_1 = arith.constant 0 : i32
    return %arg0, %c0_i32, %c0_i32_0 : i32, i32, i32
  }
  func.func @transform_1(%arg0: i32, %arg1: i32) -> (i32, i32) {
    %c0_i32 = arith.constant 0 : i32
    %c0_i32_0 = arith.constant 0 : i32
    %c0_i32_1 = arith.constant 0 : i32
    return %c0_i32, %c0_i32_0 : i32, i32
  }
  func.func @transform_2(%arg0: i32, %arg1: i32) -> (i32, i32) {
    %c0_i32 = arith.constant 0 : i32
    %c0_i32_0 = arith.constant 0 : i32
    %c0_i32_1 = arith.constant 0 : i32
    return %c0_i32, %c0_i32_0 : i32, i32
  }
  func.func @transform_3(%arg0: i32, %arg1: i32) -> (i32, i32) {
    %c0_i32 = arith.constant 0 : i32
    %c0_i32_0 = arith.constant 0 : i32
    %c0_i32_1 = arith.constant 0 : i32
    return %c0_i32, %c0_i32_0 : i32, i32
  }
  func.func @transform_4(%arg0: i32, %arg1: i32) -> (i32, i32) {
    %c0_i32 = arith.constant 0 : i32
    %c0_i32_0 = arith.constant 0 : i32
    %c0_i32_1 = arith.constant 0 : i32
    return %c0_i32, %c0_i32_0 : i32, i32
  }
  func.func @transform_5(%arg0: i32, %arg1: i32) -> (i32, i32) {
    %c0_i32 = arith.constant 0 : i32
    %c0_i32_0 = arith.constant 0 : i32
    %c0_i32_1 = arith.constant 0 : i32
    return %c0_i32, %c0_i32_0 : i32, i32
  }
  func.func @transform_6(%arg0: i32, %arg1: i32) -> (i32, i32, i32) {
    %c0_i32 = arith.constant 0 : i32
    %c0_i32_0 = arith.constant 0 : i32
    return %arg0, %arg1, %c0_i32 : i32, i32, i32
  }
}

</mosaic_0001>

<bundles_post_ra>
// kernel: multi_head_attention.1
= control target key start
LH: loop header
LB: loop body
LE: loop exit
PB: predicated region body
PF: predicated region fallthrough
CT: control target
= control target key end

     0   :  { %11 = vsyncpa [#allocation4], 0  ;;  %s6097_s0 = inlined_call_operand.vmem [shape: f32[2,8,384], index: 0, kind: input, shape index: {}]   ;;  %s6098_s1 = inlined_call_operand.vmem [shape: bf16[384,384], index: 1, kind: input, shape index: {}]   ;;  %s6099_s2 = inlined_call_operand.vmem [shape: bf16[384,384], index: 2, kind: input, shape index: {}]   ;;  %s6100_s3 = inlined_call_operand.vmem [shape: bf16[384,384], index: 3, kind: input, shape index: {}]   ;;  %s6101_s4 = inlined_call_operand.vmem [shape: bf16[384,384], index: 4, kind: input, shape index: {}]   ;;  %s6102_s5 = inlined_call_operand.vmem [shape: f32[1,384], index: 5, kind: input, shape index: {}]   ;;  %s6103_s6 = inlined_call_operand.hbm [shape: f32[2,8,384], index: 6, kind: output, shape index: {}]  }
   0x1   :  { %13 = vsyncpa [#allocation4 + $0x1], 0  ;;  %s4877_s21 = smov 0   ;;  %s4879_s22 = smov 0  }
   0x2   :  { %s4881_s23 = smov 0   ;;  %s4883_s24 = smov 0  }
   0x3   :  { %s4885_s25 = smov 0   ;;  %s4887_s26 = smov 0  }
   0x4 LB: > { %s3668_s27 = sadd.s32 4294967295, %s4835_s26   ;;  %s3669_s28 = sadd.s32 4294967294, %s4835_s26   ;;  %s4835_s26 = sphi %s4887_s26, %s19_s26   ;;  %s4831_s25 = sphi %s4885_s25, %s6112_s25   ;;  %s4827_s24 = sphi %s4883_s24, %s6111_s24   ;;  %s4823_s23 = sphi %s4881_s23, %s6110_s23   ;;  %s4819_s22 = sphi %s4879_s22, %s6109_s22   ;;  %s4815_s21 = sphi %s4877_s21, %s6108_s21  }
   0x5   : > { %s31_s29 = sadd.s32 1, %s4831_s25  ;;  %s171_s30 = sadd.s32 1, %s4823_s23 }
   0x6   : > { %p33_p0 = scmp.ge.s32.totalorder %s31_s29, 2  ;;  %p181_p1 = scmp.ne.s32.totalorder %s4823_s23, %s4819_s22 }
   0x7   : > { %p182_p2 = scmp.eq.s32.totalorder %s3668_s27, 1  ;;  %p187_p3 = scmp.ne.s32.totalorder %s4819_s22, %s4815_s21 }
   0x8   : > { %s6114_s29 = smov (%p33_p0, %s31_s29), 0  ;;  %p188_p5 = scmp.eq.s32.totalorder %s3669_s28, 1 }
   0x9   : > { %p4917_p4 = por %p182_p2, %p181_p1  ;;  %s166_s8 = ssub.s32 %s4831_s25, %s6114_s29 }
   0xa   : > { %p3672_p6 = scmp.ge.s32.totalorder %s4835_s26, 1  ;;  %p169_p7 = scmp.eq.s32.totalorder %s166_s8, 0 }
   0xb   : > { %p4924_p8 = por %p188_p5, %p187_p3  ;;  %p229_p9 = scmp.lt.s32.totalorder %s4835_s26, 3 }
   0xc   : > { %s4930_s10 = scalar_select %p169_p7, %s4823_s23, %s171_s30  }
   0xd   : > { %p230_p10 = pnand %p3672_p6, %p229_p9 }
   0xe   : > { %p259_p11 = scmp.lt.s32.totalorder (!%p230_p10), %s4827_s24, 1  ;;  %s4840_s18 = smov (!%p230_p10), 64  }
   0xf   : > { %233 = sbr.rel (%p230_p10) target bundleno = 2375 (0x947), region = 44  ;;  %s4841_s15 = smov (!%p230_p10), [#allocation3]  }
  0x10   : > { %s4288_s30 = smul.u32 (!%p230_p10), 384, %s4827_s24 }
  0x14   : > { %v4348_v0 = vld [vmem:[%s6098_s1 + $0xac] ss:$12 sps:$4 sm:$0xff]   ;;  %v4837_v2 = vmov 0   ;;  %v4352_v3 = vld [vmem:[%s6098_s1 + $0xa8] ss:$12 sps:$4 sm:$0xff]   ;;  %s260_s13 = scalar_select %p259_p11, %s4827_s24, 1 }
  0x15   : > { %v4350_v1 = vld [vmem:[%s6098_s1 + $0x22c] ss:$12 sps:$4 sm:$0xff]   ;;  %824 = vmatprep.mubr.bf16.mxu1 %v4837_v2  ;;  %751 = vmatprep.subr.bf16.mxu0 %v4348_v0  ;;  %v4353_v4 = vld [vmem:[%s6098_s1 + $0x228] ss:$12 sps:$4 sm:$0xff]   ;;  %v4358_v7 = vld [vmem:[%s6098_s1 + $0x90] ss:$12 sps:$4 sm:$0xff]  }
  0x16   : > { %792 = vmatprep.subr.bf16.mxu1 %v4350_v1  ;;  %v4354_v5 = vld [vmem:[%s6098_s1 + $0x94] ss:$12 sps:$4 sm:$0xff]   ;;  %752 = vmatpush1.bf16.msra.mxu0 %v4352_v3  ;;  %v4359_v8 = vld [vmem:[%s6098_s1 + $0x210] ss:$12 sps:$4 sm:$0xff]   ;;  %v4364_v11 = vld [vmem:[%s6098_s1 + $0x78] ss:$12 sps:$4 sm:$0xff]  }
  0x17   : > { %793 = vmatpush1.bf16.msra.mxu1 %v4353_v4  ;;  %v4356_v6 = vld [vmem:[%s6098_s1 + $0x214] ss:$12 sps:$4 sm:$0xff]   ;;  %753 = vmatprep.subr.bf16.mxu0 %v4354_v5  ;;  %v4360_v9 = vld [vmem:[%s6098_s1 + $0x7c] ss:$12 sps:$4 sm:$0xff]   ;;  %v4365_v12 = vld [vmem:[%s6098_s1 + $0x1f8] ss:$12 sps:$4 sm:$0xff]  }
  0x18   : > { %794 = vmatprep.subr.bf16.mxu1 %v4356_v6  ;;  %v4362_v10 = vld [vmem:[%s6098_s1 + $0x1fc] ss:$12 sps:$4 sm:$0xff]   ;;  %v4366_v13 = vld [vmem:[%s6098_s1 + $0x64] ss:$12 sps:$4 sm:$0xff]   ;;  %v4370_v15 = vld [vmem:[%s6098_s1 + $0x60] ss:$12 sps:$4 sm:$0xff]  }
  0x19   : > { %v4368_v14 = vld [vmem:[%s6098_s1 + $0x1e4] ss:$12 sps:$4 sm:$0xff]   ;;  %v4371_v16 = vld [vmem:[%s6098_s1 + $0x1e0] ss:$12 sps:$4 sm:$0xff]   ;;  %v4376_v19 = vld [vmem:[%s6098_s1 + $0x48] ss:$12 sps:$4 sm:$0xff]  }
  0x1a   : > { %754 = vmatpush1.bf16.msra.mxu0 %v4358_v7  ;;  %v4372_v17 = vld [vmem:[%s6098_s1 + $0x4c] ss:$12 sps:$4 sm:$0xff]   ;;  %v4377_v20 = vld [vmem:[%s6098_s1 + $0x1c8] ss:$12 sps:$4 sm:$0xff]   ;;  %v4382_v23 = vld [vmem:[%s6098_s1 + $0x30] ss:$12 sps:$4 sm:$0xff]  }
  0x1b   : > { %795 = vmatpush1.bf16.msra.mxu1 %v4359_v8  ;;  %755 = vmatprep.subr.bf16.mxu0 %v4360_v9  ;;  %v4374_v18 = vld [vmem:[%s6098_s1 + $0x1cc] ss:$12 sps:$4 sm:$0xff]   ;;  %v4378_v21 = vld [vmem:[%s6098_s1 + $0x34] ss:$12 sps:$4 sm:$0xff]   ;;  %v4383_v24 = vld [vmem:[%s6098_s1 + $0x1b0] ss:$12 sps:$4 sm:$0xff]  }
  0x1c   : > { %796 = vmatprep.subr.bf16.mxu1 %v4362_v10  ;;  %v4380_v22 = vld [vmem:[%s6098_s1 + $0x1b4] ss:$12 sps:$4 sm:$0xff]   ;;  %v4384_v25 = vld [vmem:[%s6098_s1 + $0x1c] ss:$12 sps:$4 sm:$0xff]   ;;  %s4287_s28 = smul.u32 24, %s260_s13  ;;  %vm4839_vm0 = vmmov 0  }
  0x1d   : > { %v4386_v26 = vld [vmem:[%s6098_s1 + $0x19c] ss:$12 sps:$4 sm:$0xff]   ;;  %v4388_v27 = vld [vmem:[%s6098_s1 + $0x18] ss:$12 sps:$4 sm:$0xff]   ;;  %v4394_v31 = vld [vmem:[%s6098_s1] ss:$12 sps:$4 sm:$0xff]  }
  0x1e   : > { %756 = vmatpush1.bf16.msra.mxu0 %v4364_v11  ;;  %v4389_v28 = vld [vmem:[%s6098_s1 + $0x198] ss:$12 sps:$4 sm:$0xff]   ;;  %s5028_s19 = scalar_lea.vmem %s6097_s0, %s4287_s28  ;;  %v4395_v32 = vld [vmem:[%s6098_s1 + $0x180] ss:$12 sps:$4 sm:$0xff]   ;;  %v4398_v35 = vld [vmem:[%s6098_s1 + $0x170] ss:$12 sps:$4 sm:$0xff]   ;;  %s6049_s28 = scalar_lea.hbm %s6103_s6, %s4288_s30 }
  0x1f   : > { %797 = vmatpush1.bf16.msra.mxu1 %v4365_v12  ;;  %757 = vmatprep.subr.bf16.mxu0 %v4366_v13  ;;  %v4390_v29 = vld [vmem:[%s6098_s1 + $0x4] ss:$12 sps:$4 sm:$0xff]   ;;  %v4396_v33 = vld [vmem:[%s6098_s1 + $0x16c] ss:$12 sps:$4 sm:$0xff]   ;;  %v4399_v37 = vld [vmem:[%s6098_s1 + $0x168] ss:$12 sps:$4 sm:$0xff]  }
  0x20   : > { %798 = vmatprep.subr.bf16.mxu1 %v4368_v14  ;;  %v4392_v30 = vld [vmem:[%s6098_s1 + $0x184] ss:$12 sps:$4 sm:$0xff]   ;;  %v4401_v39 = vld [vmem:[%s6098_s1 + $0x154] ss:$12 sps:$4 sm:$0xff]   ;;  %v4406_v43 = vld [vmem:[%s6098_s1 + $0x13c] ss:$12 sps:$4 sm:$0xff]  }
  0x21   : > { %v267_v34 = vld [vmem:[%s5028_s19 + $0x10] sm:$0xff]  ;;  %v4403_v40 = vld [vmem:[%s6098_s1 + $0x158] ss:$12 sps:$4 sm:$0xff]   ;;  %v4408_v44 = vld [vmem:[%s6098_s1 + $0x140] ss:$12 sps:$4 sm:$0xff]   ;;  %v4838_v11 = vmov 0.0  }
  0x22   : > { %758 = vmatpush1.bf16.msra.mxu0 %v4370_v15  ;;  %v5043_v36 = vpack.c.bf16 %v267_v34, %v267_v34  ;;  %v4400_v38 = vld [vmem:[%s6098_s1 + $0xb0] ss:$12 sps:$4 sm:$0xff]   ;;  %v4405_v42 = vld [vmem:[%s6098_s1 + $0x98] ss:$12 sps:$4 sm:$0xff]   ;;  %v4410_v46 = vld [vmem:[%s6098_s1 + $0x80] ss:$12 sps:$4 sm:$0xff]  }
  0x23   : > { %799 = vmatpush1.bf16.msra.mxu1 %v4371_v16  ;;  %759 = vmatprep.subr.bf16.mxu0 %v4372_v17  ;;  %v4404_v41 = vld [vmem:[%s6098_s1 + $0x150] ss:$12 sps:$4 sm:$0xff]   ;;  %v4409_v45 = vld [vmem:[%s6098_s1 + $0x138] ss:$12 sps:$4 sm:$0xff]   ;;  %v4413_v48 = vld [vmem:[%s6098_s1 + $0x128] ss:$12 sps:$4 sm:$0xff]  }
  0x24   : > { %800 = vmatprep.subr.bf16.mxu1 %v4374_v18  ;;  %v4411_v47 = vld [vmem:[%s6098_s1 + $0x124] ss:$12 sps:$4 sm:$0xff]   ;;  %v4414_v49 = vld [vmem:[%s6098_s1 + $0x120] ss:$12 sps:$4 sm:$0xff]   ;;  %v4415_v50 = vld [vmem:[%s6098_s1 + $0x68] ss:$12 sps:$4 sm:$0xff]  }
  0x25   : > { %v4416_v51 = vld [vmem:[%s6098_s1 + $0x10c] ss:$12 sps:$4 sm:$0xff]   ;;  %v4418_v52 = vld [vmem:[%s6098_s1 + $0x110] ss:$12 sps:$4 sm:$0xff]   ;;  %v4419_v53 = vld [vmem:[%s6098_s1 + $0x108] ss:$12 sps:$4 sm:$0xff]  }
  0x26   : > { %760 = vmatpush1.bf16.msra.mxu0 %v4376_v19  ;;  %v4420_v54 = vld [vmem:[%s6098_s1 + $0x50] ss:$12 sps:$4 sm:$0xff]   ;;  %v4421_v55 = vld [vmem:[%s6098_s1 + $0xf4] ss:$12 sps:$4 sm:$0xff]   ;;  %v266_v56 = vld [vmem:[%s5028_s19 + $0x8] sm:$0xff]  ;;  %vm2214_vm1 = vcmask 523264  }
  0x27   : > { %801 = vmatpush1.bf16.msra.mxu1 %v4377_v20  ;;  %761 = vmatprep.subr.bf16.mxu0 %v4378_v21  ;;  %v4423_v57 = vld [vmem:[%s6098_s1 + $0xf8] ss:$12 sps:$4 sm:$0xff]   ;;  %v5107_v58 = vpack.c.bf16 %v266_v56, %v266_v56  ;;  %v4424_v59 = vld [vmem:[%s6098_s1 + $0xf0] ss:$12 sps:$4 sm:$0xff]   ;;  %v4428_v62 = vld [vmem:[%s6098_s1 + $0xe0] ss:$12 sps:$4 sm:$0xff]  }
  0x28   : > { %802 = vmatprep.subr.bf16.mxu1 %v4380_v22  ;;  %v4425_v60 = vld [vmem:[%s6098_s1 + $0x38] ss:$12 sps:$4 sm:$0xff]   ;;  %v4426_v61 = vld [vmem:[%s6098_s1 + $0xdc] ss:$12 sps:$4 sm:$0xff]   ;;  %v4430_v0 = vld [vmem:[%s6098_s1 + $0x20] ss:$12 sps:$4 sm:$0xff]  }
  0x29   : > { %783 = vmatprep.mubr.bf16.mxu0 %v5107_v58  ;;  %v4429_v63 = vld [vmem:[%s6098_s1 + $0xd8] ss:$12 sps:$4 sm:$0xff]   ;;  %v4433_v3 = vld [vmem:[%s6098_s1 + $0xc8] ss:$12 sps:$4 sm:$0xff]   ;;  %v4434_v4 = vld [vmem:[%s6098_s1 + $0xc0] ss:$12 sps:$4 sm:$0xff]  }
  0x2a   : > { %762 = vmatpush1.bf16.msra.mxu0 %v4382_v23  ;;  %v4431_v1 = vld [vmem:[%s6098_s1 + $0xc4] ss:$12 sps:$4 sm:$0xff]   ;;  %v4435_v5 = vld [vmem:[%s6098_s1 + $0x8] ss:$12 sps:$4 sm:$0xff]   ;;  %v4438_v7 = vld [vmem:[%s6099_s2 + $0xac] ss:$12 sps:$4 sm:$0xff]  }
  0x2b   : > { %803 = vmatpush1.bf16.msra.mxu1 %v4383_v24  ;;  %763 = vmatprep.subr.bf16.mxu0 %v4384_v25  ;;  %v265_v6 = vld [vmem:[%s5028_s19] sm:$0xff]  ;;  %v4436_v9 = vld [vmem:[%s6099_s2 + $0xa8] ss:$12 sps:$4 sm:$0xff]   ;;  %v4439_v10 = vld [vmem:[%s6098_s1 + $0x230] ss:$12 sps:$4 sm:$0xff]   ;;  %vm2276_vm2 = vcmask 1043456  }
  0x2c   : > { %804 = vmatprep.subr.bf16.mxu1 %v4386_v26  ;;  %v5145_v8 = vpack.c.bf16 %v265_v6, %v265_v6  ;;  %v4442_v12 = vld [vmem:[%s6099_s2 + $0x94] ss:$12 sps:$4 sm:$0xff]   ;;  %v4440_v13 = vld [vmem:[%s6099_s2 + $0x90] ss:$12 sps:$4 sm:$0xff]   ;;  %v4443_v14 = vld [vmem:[%s6098_s1 + $0x218] ss:$12 sps:$4 sm:$0xff]  }
  0x2d   : > { %v4446_v15 = vld [vmem:[%s6099_s2 + $0x7c] ss:$12 sps:$4 sm:$0xff]   ;;  %v4444_v16 = vld [vmem:[%s6099_s2 + $0x78] ss:$12 sps:$4 sm:$0xff]   ;;  %v4447_v17 = vld [vmem:[%s6098_s1 + $0x200] ss:$12 sps:$4 sm:$0xff]  }
  0x2e   : > { %764 = vmatpush1.bf16.msra.mxu0 %v4388_v27  ;;  %v4450_v18 = vld [vmem:[%s6099_s2 + $0x64] ss:$12 sps:$4 sm:$0xff]   ;;  %v4448_v19 = vld [vmem:[%s6099_s2 + $0x60] ss:$12 sps:$4 sm:$0xff]   ;;  %v4451_v20 = vld [vmem:[%s6098_s1 + $0x1e8] ss:$12 sps:$4 sm:$0xff]  }
  0x2f   : > { %805 = vmatpush1.bf16.msra.mxu1 %v4389_v28  ;;  %765 = vmatprep.subr.bf16.mxu0 %v4390_v29  ;;  %v4454_v21 = vld [vmem:[%s6099_s2 + $0x4c] ss:$12 sps:$4 sm:$0xff]   ;;  %v4452_v22 = vld [vmem:[%s6099_s2 + $0x48] ss:$12 sps:$4 sm:$0xff]   ;;  %v4455_v23 = vld [vmem:[%s6098_s1 + $0x1d0] ss:$12 sps:$4 sm:$0xff]  }
  0x30   : > { %806 = vmatprep.subr.bf16.mxu1 %v4392_v30  ;;  %v4458_v24 = vld [vmem:[%s6099_s2 + $0x34] ss:$12 sps:$4 sm:$0xff]   ;;  %v4456_v25 = vld [vmem:[%s6099_s2 + $0x30] ss:$12 sps:$4 sm:$0xff]   ;;  %v4459_v26 = vld [vmem:[%s6098_s1 + $0x1b8] ss:$12 sps:$4 sm:$0xff]  }
  0x31   : > { %v4462_v27 = vld [vmem:[%s6099_s2 + $0x1c] ss:$12 sps:$4 sm:$0xff]   ;;  %v4460_v28 = vld [vmem:[%s6099_s2 + $0x18] ss:$12 sps:$4 sm:$0xff]   ;;  %v4463_v29 = vld [vmem:[%s6098_s1 + $0x1a0] ss:$12 sps:$4 sm:$0xff]  }
  0x32   : > { %766 = vmatpush1.bf16.msra.mxu0 %v4394_v31  ;;  %v4466_v30 = vld [vmem:[%s6099_s2 + $0x4] ss:$12 sps:$4 sm:$0xff]   ;;  %v4464_v31 = vld [vmem:[%s6099_s2] ss:$12 sps:$4 sm:$0xff]   ;;  %vm2262_vm4 = vcmask 64512   ;;  %vm2323_vm5 = vcmask 519168  }
  0x33   : > { %807 = vmatpush1.bf16.msra.mxu1 %v4395_v32  ;;  %767 = vmatprep.subr.bf16.mxu0 %v4396_v33  ;;  %v4467_v32 = vld [vmem:[%s6098_s1 + $0x188] ss:$12 sps:$4 sm:$0xff]   ;;  %v4470_v33 = vld [vmem:[%s6099_s2 + $0x16c] ss:$12 sps:$4 sm:$0xff]   ;;  %v4498_v56 = vld [vmem:[%s6099_s2 + $0xf0] ss:$12 sps:$4 sm:$0xff]  }
  0x34   : > { %3986 = vmatprep.subr.bf16.mxu1 %v4398_v35  ;;  %v4473_v34 = vld [vmem:[%s6099_s2 + $0x22c] ss:$12 sps:$4 sm:$0xff]   ;;  %v4468_v35 = vld [vmem:[%s6099_s2 + $0x168] ss:$12 sps:$4 sm:$0xff]   ;;  %v4520_v6 = vld [vmem:[%s6099_s2 + $0x230] ss:$12 sps:$4 sm:$0xff]  }
  0x35   : > { %vm2446_vm6 = vcmask 1043968   ;;  %s4763_s19 = sshll.u32 %s4841_s15, 4  ;;  %s4764_s19 = int_to_ptr.vmem [resolvable:$false] %s4763_s19 }
  0x36   : > { %825 = vmatmul.mubr.bf16.vlgmr.msra.gmra.mxu1 %v5043_v36  ;;  %768 = vmatpush2.bf16.msra.mxu0 %v4399_v37  ;;  %v4471_v37 = vld [vmem:[%s6099_s2 + $0x228] ss:$12 sps:$4 sm:$0xff]   ;;  %s4765_s16 = scalar_lea.vmem %s4764_s19, 768 }
  0x37   : > { %3987 = vmatpush3.bf16.msra.mxu1 %v4400_v38  ;;  %769 = vmatprep.subr.bf16.mxu0 %v4401_v39  ;;  %v4476_v38 = vld [vmem:[%s6099_s2 + $0x154] ss:$12 sps:$4 sm:$0xff]  }
  0x38   : > { %3988 = vmatprep.subr.bf16.mxu1 %v4403_v40  ;;  %865 = vmatprep.mubr.bf16.mxu1 %v5107_v58  ;;  %v4479_v39 = vld [vmem:[%s6099_s2 + $0x214] ss:$12 sps:$4 sm:$0xff]   ;;  %v4474_v40 = vld [vmem:[%s6099_s2 + $0x150] ss:$12 sps:$4 sm:$0xff]  }
  0x3a   : > { %770 = vmatpush2.bf16.msra.mxu0 %v4404_v41  ;;  %v4477_v41 = vld [vmem:[%s6099_s2 + $0x210] ss:$12 sps:$4 sm:$0xff]  }
  0x3b   : > { %3989 = vmatpush3.bf16.msra.mxu1 %v4405_v42  ;;  %771 = vmatprep.subr.bf16.mxu0 %v4406_v43  ;;  %v4482_v42 = vld [vmem:[%s6099_s2 + $0x13c] ss:$12 sps:$4 sm:$0xff]  }
  0x3c   : > { %3990 = vmatprep.subr.bf16.mxu1 %v4408_v44  ;;  %v4485_v43 = vld [vmem:[%s6099_s2 + $0x1fc] ss:$12 sps:$4 sm:$0xff]   ;;  %v4480_v44 = vld [vmem:[%s6099_s2 + $0x138] ss:$12 sps:$4 sm:$0xff]  }
  0x3e   : > { %772 = vmatpush2.bf16.msra.mxu0 %v4409_v45  ;;  %v4483_v45 = vld [vmem:[%s6099_s2 + $0x1f8] ss:$12 sps:$4 sm:$0xff]  }
  0x3f   : > { %3991 = vmatpush3.bf16.msra.mxu1 %v4410_v46  ;;  %773 = vmatprep.subr.bf16.mxu0 %v4411_v47  ;;  %v4488_v46 = vld [vmem:[%s6099_s2 + $0x124] ss:$12 sps:$4 sm:$0xff]  }
  0x40   : > { %3992 = vmatprep.subr.bf16.mxu1 %v4413_v48  ;;  %v4491_v47 = vld [vmem:[%s6099_s2 + $0x1e4] ss:$12 sps:$4 sm:$0xff]   ;;  %v4486_v48 = vld [vmem:[%s6099_s2 + $0x120] ss:$12 sps:$4 sm:$0xff]  }
  0x42   : > { %774 = vmatpush2.bf16.msra.mxu0 %v4414_v49  ;;  %v4489_v49 = vld [vmem:[%s6099_s2 + $0x1e0] ss:$12 sps:$4 sm:$0xff]  }
  0x43   : > { %3993 = vmatpush3.bf16.msra.mxu1 %v4415_v50  ;;  %775 = vmatprep.subr.bf16.mxu0 %v4416_v51  ;;  %v4494_v50 = vld [vmem:[%s6099_s2 + $0x10c] ss:$12 sps:$4 sm:$0xff]  }
  0x44   : > { %3994 = vmatprep.subr.bf16.mxu1 %v4418_v52  ;;  %v4497_v51 = vld [vmem:[%s6099_s2 + $0x1cc] ss:$12 sps:$4 sm:$0xff]   ;;  %v4492_v52 = vld [vmem:[%s6099_s2 + $0x108] ss:$12 sps:$4 sm:$0xff]  }
  0x46   : > { %776 = vmatpush2.bf16.msra.mxu0 %v4419_v53  ;;  %v4495_v53 = vld [vmem:[%s6099_s2 + $0x1c8] ss:$12 sps:$4 sm:$0xff]  }
  0x47   : > { %3995 = vmatpush3.bf16.msra.mxu1 %v4420_v54  ;;  %777 = vmatprep.subr.bf16.mxu0 %v4421_v55  ;;  %v4500_v54 = vld [vmem:[%s6099_s2 + $0xf4] ss:$12 sps:$4 sm:$0xff]  }
  0x48   : > { %3996 = vmatprep.subr.bf16.mxu1 %v4423_v57  ;;  %v4503_v55 = vld [vmem:[%s6099_s2 + $0x1b4] ss:$12 sps:$4 sm:$0xff]   ;;  %v4501_v57 = vld [vmem:[%s6099_s2 + $0x1b0] ss:$12 sps:$4 sm:$0xff]  }
  0x4a   : > { %778 = vmatpush2.bf16.msra.mxu0 %v4424_v59  ;;  %v4506_v59 = vld [vmem:[%s6099_s2 + $0xdc] ss:$12 sps:$4 sm:$0xff]  }
  0x4b   : > { %3997 = vmatpush3.bf16.msra.mxu1 %v4425_v60  ;;  %779 = vmatprep.subr.bf16.mxu0 %v4426_v61  ;;  %v4509_v60 = vld [vmem:[%s6099_s2 + $0x19c] ss:$12 sps:$4 sm:$0xff]   ;;  %v4504_v61 = vld [vmem:[%s6099_s2 + $0xd8] ss:$12 sps:$4 sm:$0xff]  }
  0x4c   : > { %3998 = vmatprep.subr.bf16.mxu1 %v4428_v62  ;;  %v4507_v62 = vld [vmem:[%s6099_s2 + $0x198] ss:$12 sps:$4 sm:$0xff]  }
  0x4e   : > { %780 = vmatpush2.bf16.msra.mxu0 %v4429_v63  ;;  %v4512_v63 = vld [vmem:[%s6099_s2 + $0xc4] ss:$12 sps:$4 sm:$0xff]  }
  0x4f   : > { %3999 = vmatpush3.bf16.msra.mxu1 %v4430_v0  ;;  %781 = vmatprep.subr.bf16.mxu0 %v4431_v1  ;;  %v4515_v0 = vld [vmem:[%s6099_s2 + $0x184] ss:$12 sps:$4 sm:$0xff]   ;;  %v4510_v1 = vld [vmem:[%s6099_s2 + $0xc0] ss:$12 sps:$4 sm:$0xff]  }
  0x50   : > { %4000 = vmatprep.subr.bf16.mxu1 %v4433_v3  ;;  %v4513_v3 = vld [vmem:[%s6099_s2 + $0x180] ss:$12 sps:$4 sm:$0xff]  }
  0x52   : > { %782 = vmatpush2.bf16.msra.mxu0 %v4434_v4  ;;  %v4516_v4 = vld [vmem:[%s6099_s2 + $0x170] ss:$12 sps:$4 sm:$0xff]  }
  0x53   : > { %4001 = vmatpush3.bf16.msra.mxu1 %v4435_v5  ;;  %4134 = vmatprep.subr.bf16.mxu0 %v4838_v11  ;;  %v4517_v5 = vld [vmem:[%s6099_s2 + $0xb0] ss:$12 sps:$4 sm:$0xff]  }
  0x54   : > { %1396 = vmatprep.subr.bf16.mxu1 %v4438_v7  ;;  %v4518_v7 = vld [vmem:[%s6099_s2 + $0x158] ss:$12 sps:$4 sm:$0xff]  }
  0x55   : > { %784 = vmatmul.mubr.bf16.vlgmr.msra.gmra.mxu0 %v5145_v8 }
  0x56   : > { %866 = vmatmul.mubr.bf16.vlgmr.msra.gmra.mxu1 %v5145_v8  ;;  %4135 = vmatpush3.bf16.msra.mxu0 %v4439_v10  ;;  %v4523_v10 = vld [vmem:[%s6099_s2 + $0x218] ss:$12 sps:$4 sm:$0xff]  }
  0x57   : > { %1397 = vmatpush1.bf16.msra.mxu1 %v4436_v9  ;;  %4136 = vmatprep.subr.bf16.mxu0 %v4838_v11  ;;  %v4519_v9 = vld [vmem:[%s6099_s2 + $0x98] ss:$12 sps:$4 sm:$0xff]  }
  0x58   : > { %1398 = vmatprep.subr.bf16.mxu1 %v4442_v12  ;;  %4150 = vmatprep.mubr.msk.bf16.mxu0 %vm4839_vm0, %v4838_v11  ;;  %v4521_v12 = vld [vmem:[%s6099_s2 + $0x140] ss:$12 sps:$4 sm:$0xff]  }
  0x59   : > { %1428 = vmatprep.mubr.bf16.mxu1 %v5107_v58 }
  0x5a   : > { %4137 = vmatpush3.bf16.msra.mxu0 %v4443_v14  ;;  %v4526_v14 = vld [vmem:[%s6099_s2 + $0x200] ss:$12 sps:$4 sm:$0xff]  }
  0x5b   : > { %1399 = vmatpush1.bf16.msra.mxu1 %v4440_v13  ;;  %4138 = vmatprep.subr.bf16.mxu0 %v4838_v11  ;;  %v4522_v13 = vld [vmem:[%s6099_s2 + $0x80] ss:$12 sps:$4 sm:$0xff]  }
  0x5c   : > { %1400 = vmatprep.subr.bf16.mxu1 %v4446_v15  ;;  %v4524_v15 = vld [vmem:[%s6099_s2 + $0x128] ss:$12 sps:$4 sm:$0xff]  }
  0x5e   : > { %4139 = vmatpush3.bf16.msra.mxu0 %v4447_v17  ;;  %v4529_v17 = vld [vmem:[%s6099_s2 + $0x1e8] ss:$12 sps:$4 sm:$0xff]  }
  0x5f   : > { %1401 = vmatpush1.bf16.msra.mxu1 %v4444_v16  ;;  %4140 = vmatprep.subr.bf16.mxu0 %v4838_v11  ;;  %v4525_v16 = vld [vmem:[%s6099_s2 + $0x68] ss:$12 sps:$4 sm:$0xff]  }
  0x60   : > { %1402 = vmatprep.subr.bf16.mxu1 %v4450_v18  ;;  %v4527_v18 = vld [vmem:[%s6099_s2 + $0x110] ss:$12 sps:$4 sm:$0xff]  }
  0x62   : > { %4141 = vmatpush3.bf16.msra.mxu0 %v4451_v20  ;;  %v4530_v20 = vld [vmem:[%s6099_s2 + $0xf8] ss:$12 sps:$4 sm:$0xff]  }
  0x63   : > { %1403 = vmatpush1.bf16.msra.mxu1 %v4448_v19  ;;  %4142 = vmatprep.subr.bf16.mxu0 %v4838_v11  ;;  %v4528_v19 = vld [vmem:[%s6099_s2 + $0x50] ss:$12 sps:$4 sm:$0xff]  }
  0x64   : > { %1404 = vmatprep.subr.bf16.mxu1 %v4454_v21  ;;  %v4532_v21 = vld [vmem:[%s6099_s2 + $0x1d0] ss:$12 sps:$4 sm:$0xff]  }
  0x66   : > { %4143 = vmatpush3.bf16.msra.mxu0 %v4455_v23  ;;  %v4535_v23 = vld [vmem:[%s6099_s2 + $0x1b8] ss:$12 sps:$4 sm:$0xff]  }
  0x67   : > { %1405 = vmatpush1.bf16.msra.mxu1 %v4452_v22  ;;  %4144 = vmatprep.subr.bf16.mxu0 %v4838_v11  ;;  %v4531_v22 = vld [vmem:[%s6099_s2 + $0x38] ss:$12 sps:$4 sm:$0xff]  }
  0x68   : > { %1406 = vmatprep.subr.bf16.mxu1 %v4458_v24  ;;  %v4533_v24 = vld [vmem:[%s6099_s2 + $0xe0] ss:$12 sps:$4 sm:$0xff]  }
  0x6a   : > { %4145 = vmatpush3.bf16.msra.mxu0 %v4459_v26  ;;  %v4538_v26 = vld [vmem:[%s6099_s2 + $0x1a0] ss:$12 sps:$4 sm:$0xff]  }
  0x6b   : > { %1407 = vmatpush1.bf16.msra.mxu1 %v4456_v25  ;;  %4146 = vmatprep.subr.bf16.mxu0 %v4838_v11  ;;  %v4534_v25 = vld [vmem:[%s6099_s2 + $0x20] ss:$12 sps:$4 sm:$0xff]  }
  0x6c   : > { %1408 = vmatprep.subr.bf16.mxu1 %v4462_v27  ;;  %v4536_v27 = vld [vmem:[%s6099_s2 + $0xc8] ss:$12 sps:$4 sm:$0xff]  }
  0x6e   : > { %4147 = vmatpush3.bf16.msra.mxu0 %v4463_v29  ;;  %v4539_v29 = vld [vmem:[%s6099_s2 + $0x188] ss:$12 sps:$4 sm:$0xff]  }
  0x6f   : > { %1409 = vmatpush1.bf16.msra.mxu1 %v4460_v28  ;;  %4148 = vmatprep.subr.bf16.mxu0 %v4838_v11  ;;  %v4537_v28 = vld [vmem:[%s6099_s2 + $0x8] ss:$12 sps:$4 sm:$0xff]  }
  0x70   : > { %1410 = vmatprep.subr.bf16.mxu1 %v4466_v30  ;;  %v4542_v30 = vld [vmem:[%s6100_s3 + $0xac] ss:$12 sps:$4 sm:$0xff]  }
  0x72   : > { %4149 = vmatpush3.bf16.msra.mxu0 %v4467_v32  ;;  %v4540_v32 = vld [vmem:[%s6100_s3 + $0xa8] ss:$12 sps:$4 sm:$0xff]  }
  0x73   : > { %1411 = vmatpush1.bf16.msra.mxu1 %v4464_v31  ;;  %1437 = vmatprep.subr.bf16.mxu0 %v4473_v34  ;;  %v4566_v31 = vld [vmem:[%s6100_s3 + $0x22c] ss:$12 sps:$4 sm:$0xff]   ;;  %v4545_v34 = vld [vmem:[%s6100_s3 + $0x94] ss:$12 sps:$4 sm:$0xff]  }
  0x74   : > { %1412 = vmatprep.subr.bf16.mxu1 %v4470_v33  ;;  %v4564_v33 = vld [vmem:[%s6100_s3 + $0x228] ss:$12 sps:$4 sm:$0xff]  }
  0x75   : > { %4151 = vmatmul.mubr.bf16.vlgmr.msra.gmra.mxu0 %v5043_v36 }
  0x76   : > { %1438 = vmatpush1.bf16.msra.mxu0 %v4471_v37  ;;  %1469 = vmatprep.mubr.bf16.mxu0 %v4837_v2  ;;  %v4543_v37 = vld [vmem:[%s6100_s3 + $0x90] ss:$12 sps:$4 sm:$0xff]  }
  0x77   : > { %1413 = vmatpush2.bf16.msra.mxu1 %v4468_v35  ;;  %1439 = vmatprep.subr.bf16.mxu0 %v4479_v39  ;;  %v4572_v35 = vld [vmem:[%s6100_s3 + $0x214] ss:$12 sps:$4 sm:$0xff]   ;;  %v4570_v39 = vld [vmem:[%s6100_s3 + $0x210] ss:$12 sps:$4 sm:$0xff]  }
  0x78   : > { %1414 = vmatprep.subr.bf16.mxu1 %v4476_v38  ;;  %v4548_v38 = vld [vmem:[%s6100_s3 + $0x7c] ss:$12 sps:$4 sm:$0xff]  }
  0x7a   : > { %1440 = vmatpush1.bf16.msra.mxu0 %v4477_v41  ;;  %v4546_v41 = vld [vmem:[%s6100_s3 + $0x78] ss:$12 sps:$4 sm:$0xff]  }
  0x7b   : > { %1415 = vmatpush2.bf16.msra.mxu1 %v4474_v40  ;;  %1441 = vmatprep.subr.bf16.mxu0 %v4485_v43  ;;  %v4578_v40 = vld [vmem:[%s6100_s3 + $0x1fc] ss:$12 sps:$4 sm:$0xff]   ;;  %v4551_v43 = vld [vmem:[%s6100_s3 + $0x64] ss:$12 sps:$4 sm:$0xff]  }
  0x7c   : > { %1416 = vmatprep.subr.bf16.mxu1 %v4482_v42  ;;  %v4576_v42 = vld [vmem:[%s6100_s3 + $0x1f8] ss:$12 sps:$4 sm:$0xff]  }
  0x7e   : > { %1442 = vmatpush1.bf16.msra.mxu0 %v4483_v45  ;;  %v4549_v45 = vld [vmem:[%s6100_s3 + $0x60] ss:$12 sps:$4 sm:$0xff]  }
  0x7f   : > { %1417 = vmatpush2.bf16.msra.mxu1 %v4480_v44  ;;  %1443 = vmatprep.subr.bf16.mxu0 %v4491_v47  ;;  %v4584_v44 = vld [vmem:[%s6100_s3 + $0x1e4] ss:$12 sps:$4 sm:$0xff]   ;;  %v4554_v47 = vld [vmem:[%s6100_s3 + $0x4c] ss:$12 sps:$4 sm:$0xff]  }
  0x80   : > { %1418 = vmatprep.subr.bf16.mxu1 %v4488_v46  ;;  %v4582_v46 = vld [vmem:[%s6100_s3 + $0x1e0] ss:$12 sps:$4 sm:$0xff]  }
  0x82   : > { %1444 = vmatpush1.bf16.msra.mxu0 %v4489_v49  ;;  %v4552_v49 = vld [vmem:[%s6100_s3 + $0x48] ss:$12 sps:$4 sm:$0xff]  }
  0x83   : > { %1419 = vmatpush2.bf16.msra.mxu1 %v4486_v48  ;;  %1445 = vmatprep.subr.bf16.mxu0 %v4497_v51  ;;  %v4590_v48 = vld [vmem:[%s6100_s3 + $0x1cc] ss:$12 sps:$4 sm:$0xff]   ;;  %v4557_v51 = vld [vmem:[%s6100_s3 + $0x34] ss:$12 sps:$4 sm:$0xff]  }
  0x84   : > { %1420 = vmatprep.subr.bf16.mxu1 %v4494_v50  ;;  %v4588_v50 = vld [vmem:[%s6100_s3 + $0x1c8] ss:$12 sps:$4 sm:$0xff]  }
  0x86   : > { %1446 = vmatpush1.bf16.msra.mxu0 %v4495_v53  ;;  %v4555_v53 = vld [vmem:[%s6100_s3 + $0x30] ss:$12 sps:$4 sm:$0xff]  }
  0x87   : > { %1421 = vmatpush2.bf16.msra.mxu1 %v4492_v52  ;;  %1447 = vmatprep.subr.bf16.mxu0 %v4503_v55  ;;  %v4596_v52 = vld [vmem:[%s6100_s3 + $0x1b4] ss:$12 sps:$4 sm:$0xff]   ;;  %v4560_v55 = vld [vmem:[%s6100_s3 + $0x1c] ss:$12 sps:$4 sm:$0xff]  }
  0x88   : > { %1422 = vmatprep.subr.bf16.mxu1 %v4500_v54  ;;  %v4594_v54 = vld [vmem:[%s6100_s3 + $0x1b0] ss:$12 sps:$4 sm:$0xff]  }
  0x8a   : > { %1448 = vmatpush1.bf16.msra.mxu0 %v4501_v57  ;;  %v4558_v57 = vld [vmem:[%s6100_s3 + $0x18] ss:$12 sps:$4 sm:$0xff]  }
  0x8b   : > { %1423 = vmatpush2.bf16.msra.mxu1 %v4498_v56  ;;  %1449 = vmatprep.subr.bf16.mxu0 %v4509_v60  ;;  %v4602_v56 = vld [vmem:[%s6100_s3 + $0x19c] ss:$12 sps:$4 sm:$0xff]   ;;  %v4563_v60 = vld [vmem:[%s6100_s3 + $0x4] ss:$12 sps:$4 sm:$0xff]  }
  0x8c   : > { %1424 = vmatprep.subr.bf16.mxu1 %v4506_v59  ;;  %v4600_v59 = vld [vmem:[%s6100_s3 + $0x198] ss:$12 sps:$4 sm:$0xff]  }
  0x8e   : > { %1450 = vmatpush1.bf16.msra.mxu0 %v4507_v62  ;;  %v4561_v62 = vld [vmem:[%s6100_s3] ss:$12 sps:$4 sm:$0xff]  }
  0x8f   : > { %1425 = vmatpush2.bf16.msra.mxu1 %v4504_v61  ;;  %1451 = vmatprep.subr.bf16.mxu0 %v4515_v0  ;;  %v4608_v61 = vld [vmem:[%s6100_s3 + $0x184] ss:$12 sps:$4 sm:$0xff]   ;;  %v4569_v0 = vld [vmem:[%s6100_s3 + $0x16c] ss:$12 sps:$4 sm:$0xff]  }
  0x90   : > { %1426 = vmatprep.subr.bf16.mxu1 %v4512_v63  ;;  %v4606_v63 = vld [vmem:[%s6100_s3 + $0x180] ss:$12 sps:$4 sm:$0xff]  }
  0x92   : > { %1452 = vmatpush1.bf16.msra.mxu0 %v4513_v3  ;;  %v4567_v3 = vld [vmem:[%s6100_s3 + $0x168] ss:$12 sps:$4 sm:$0xff]  }
  0x93   : > { %1427 = vmatpush2.bf16.msra.mxu1 %v4510_v1  ;;  %4017 = vmatprep.subr.bf16.mxu0 %v4516_v4  ;;  %v4612_v1 = vld [vmem:[%s6100_s3 + $0x170] ss:$12 sps:$4 sm:$0xff]  }
  0x94   : > { %4154 = vmatprep.subr.bf16.mxu1 %v4838_v11  ;;  %v4613_v4 = vld [vmem:[%s6100_s3 + $0xb0] ss:$12 sps:$4 sm:$0xff]  }
  0x95   : > { %1470 = vmatmul.mubr.bf16.vlgmr.msra.gmra.mxu0 %v5043_v36 }
  0x96   : > { %1429 = vmatmul.mubr.bf16.vlgmr.msra.gmra.mxu1 %v5145_v8  ;;  %4018 = vmatpush3.bf16.msra.mxu0 %v4517_v5  ;;  %v4575_v5 = vld [vmem:[%s6100_s3 + $0x154] ss:$12 sps:$4 sm:$0xff]  }
  0x97   : > { %4155 = vmatpush3.bf16.msra.mxu1 %v4520_v6  ;;  %4019 = vmatprep.subr.bf16.mxu0 %v4518_v7  ;;  %v4614_v6 = vld [vmem:[%s6100_s3 + $0x158] ss:$12 sps:$4 sm:$0xff]   ;;  %v4573_v7 = vld [vmem:[%s6100_s3 + $0x150] ss:$12 sps:$4 sm:$0xff]  }
  0x98   : > { %4156 = vmatprep.subr.bf16.mxu1 %v4838_v11  ;;  %1510 = vmatprep.mubr.bf16.mxu0 %v5107_v58 }
  0x99   : > { %4170 = vmatprep.mubr.msk.bf16.mxu1 %vm4839_vm0, %v4838_v11 }
  0x9a   : > { %4020 = vmatpush3.bf16.msra.mxu0 %v4519_v9  ;;  %v4615_v9 = vld [vmem:[%s6100_s3 + $0x98] ss:$12 sps:$4 sm:$0xff]  }
  0x9b   : > { %4157 = vmatpush3.bf16.msra.mxu1 %v4523_v10  ;;  %4021 = vmatprep.subr.bf16.mxu0 %v4521_v12  ;;  %v4581_v10 = vld [vmem:[%s6100_s3 + $0x13c] ss:$12 sps:$4 sm:$0xff]   ;;  %v4616_v12 = vld [vmem:[%s6100_s3 + $0x140] ss:$12 sps:$4 sm:$0xff]  }
  0x9c   : > { %4158 = vmatprep.subr.bf16.mxu1 %v4838_v11 }
  0x9e   : > { %4022 = vmatpush3.bf16.msra.mxu0 %v4522_v13  ;;  %v4579_v13 = vld [vmem:[%s6100_s3 + $0x138] ss:$12 sps:$4 sm:$0xff]  }
  0x9f   : > { %4159 = vmatpush3.bf16.msra.mxu1 %v4526_v14  ;;  %4023 = vmatprep.subr.bf16.mxu0 %v4524_v15  ;;  %v4617_v14 = vld [vmem:[%s6100_s3 + $0x80] ss:$12 sps:$4 sm:$0xff]   ;;  %v4587_v15 = vld [vmem:[%s6100_s3 + $0x124] ss:$12 sps:$4 sm:$0xff]  }
  0xa0   : > { %4160 = vmatprep.subr.bf16.mxu1 %v4838_v11 }
  0xa2   : > { %4024 = vmatpush3.bf16.msra.mxu0 %v4525_v16  ;;  %v4619_v16 = vld [vmem:[%s6100_s3 + $0x128] ss:$12 sps:$4 sm:$0xff]  }
  0xa3   : > { %4161 = vmatpush3.bf16.msra.mxu1 %v4529_v17  ;;  %4025 = vmatprep.subr.bf16.mxu0 %v4527_v18  ;;  %v4585_v17 = vld [vmem:[%s6100_s3 + $0x120] ss:$12 sps:$4 sm:$0xff]  }
  0xa4   : > { %4162 = vmatprep.subr.bf16.mxu1 %v4838_v11  ;;  %v4593_v18 = vld [vmem:[%s6100_s3 + $0x10c] ss:$12 sps:$4 sm:$0xff]  }
  0xa6   : > { %4026 = vmatpush3.bf16.msra.mxu0 %v4528_v19  ;;  %v4622_v19 = vld [vmem:[%s6100_s3 + $0x110] ss:$12 sps:$4 sm:$0xff]  }
  0xa7   : > { %4163 = vmatpush3.bf16.msra.mxu1 %v4532_v21  ;;  %4027 = vmatprep.subr.bf16.mxu0 %v4530_v20  ;;  %v4591_v20 = vld [vmem:[%s6100_s3 + $0x108] ss:$12 sps:$4 sm:$0xff]   ;;  %v4623_v21 = vld [vmem:[%s6100_s3 + $0x50] ss:$12 sps:$4 sm:$0xff]  }
  0xa8   : > { %4164 = vmatprep.subr.bf16.mxu1 %v4838_v11 }
  0xaa   : > { %4028 = vmatpush3.bf16.msra.mxu0 %v4531_v22  ;;  %v4599_v22 = vld [vmem:[%s6100_s3 + $0xf4] ss:$12 sps:$4 sm:$0xff]  }
  0xab   : > { %4165 = vmatpush3.bf16.msra.mxu1 %v4535_v23  ;;  %4029 = vmatprep.subr.bf16.mxu0 %v4533_v24  ;;  %v4625_v23 = vld [vmem:[%s6100_s3 + $0xf8] ss:$12 sps:$4 sm:$0xff]   ;;  %v4597_v24 = vld [vmem:[%s6100_s3 + $0xf0] ss:$12 sps:$4 sm:$0xff]  }
  0xac   : > { %4166 = vmatprep.subr.bf16.mxu1 %v4838_v11 }
  0xae   : > { %4030 = vmatpush3.bf16.msra.mxu0 %v4534_v25  ;;  %v4626_v25 = vld [vmem:[%s6100_s3 + $0x38] ss:$12 sps:$4 sm:$0xff]  }
  0xaf   : > { %4167 = vmatpush3.bf16.msra.mxu1 %v4538_v26  ;;  %4031 = vmatprep.subr.bf16.mxu0 %v4536_v27  ;;  %v4605_v26 = vld [vmem:[%s6100_s3 + $0xdc] ss:$12 sps:$4 sm:$0xff]   ;;  %v4628_v27 = vld [vmem:[%s6100_s3 + $0xe0] ss:$12 sps:$4 sm:$0xff]  }
  0xb0   : > { %4168 = vmatprep.subr.bf16.mxu1 %v4838_v11 }
  0xb2   : > { %4032 = vmatpush3.bf16.msra.mxu0 %v4537_v28  ;;  %v4603_v28 = vld [vmem:[%s6100_s3 + $0xd8] ss:$12 sps:$4 sm:$0xff]  }
  0xb3   : > { %4169 = vmatpush3.bf16.msra.mxu1 %v4539_v29  ;;  %2038 = vmatprep.subr.bf16.mxu0 %v4542_v30  ;;  %v4629_v29 = vld [vmem:[%s6100_s3 + $0x20] ss:$12 sps:$4 sm:$0xff]   ;;  %v4611_v30 = vld [vmem:[%s6100_s3 + $0xc4] ss:$12 sps:$4 sm:$0xff]  }
  0xb4   : > { %2079 = vmatprep.subr.bf16.mxu1 %v4566_v31  ;;  %v4631_v31 = vld [vmem:[%s6100_s3 + $0xc8] ss:$12 sps:$4 sm:$0xff]  }
  0xb5   : > { %1511 = vmatmul.mubr.bf16.vlgmr.msra.gmra.mxu0 %v5145_v8 }
  0xb6   : > { %4171 = vmatmul.mubr.bf16.vlgmr.msra.gmra.mxu1 %v5043_v36  ;;  %2039 = vmatpush1.bf16.msra.mxu0 %v4540_v32  ;;  %v4609_v32 = vld [vmem:[%s6100_s3 + $0xc0] ss:$12 sps:$4 sm:$0xff]  }
  0xb7   : > { %2080 = vmatpush1.bf16.msra.mxu1 %v4564_v33  ;;  %2040 = vmatprep.subr.bf16.mxu0 %v4545_v34  ;;  %v4632_v33 = vld [vmem:[%s6100_s3 + $0x8] ss:$12 sps:$4 sm:$0xff]   ;;  %v4618_v34 = vld [vmem:[%s6100_s3 + $0x230] ss:$12 sps:$4 sm:$0xff]  }
  0xb8   : > { %2081 = vmatprep.subr.bf16.mxu1 %v4572_v35  ;;  %2111 = vmatprep.mubr.bf16.mxu1 %v4837_v2 }
  0xb9   : > { %2070 = vmatprep.mubr.bf16.mxu0 %v5107_v58 }
  0xba   : > { %2041 = vmatpush1.bf16.msra.mxu0 %v4543_v37  ;;  %v4621_v37 = vld [vmem:[%s6100_s3 + $0x218] ss:$12 sps:$4 sm:$0xff]  }
  0xbb   : > { %2082 = vmatpush1.bf16.msra.mxu1 %v4570_v39  ;;  %2042 = vmatprep.subr.bf16.mxu0 %v4548_v38 }
  0xbc   : > { %2083 = vmatprep.subr.bf16.mxu1 %v4578_v40 }
  0xbe   : > { %2043 = vmatpush1.bf16.msra.mxu0 %v4546_v41  ;;  %v4627_v41 = vld [vmem:[%s6100_s3 + $0x1e8] ss:$12 sps:$4 sm:$0xff]  }
  0xbf   : > { %2084 = vmatpush1.bf16.msra.mxu1 %v4576_v42  ;;  %2044 = vmatprep.subr.bf16.mxu0 %v4551_v43  ;;  %v4630_v42 = vld [vmem:[%s6100_s3 + $0x1d0] ss:$12 sps:$4 sm:$0xff]   ;;  %v4633_v43 = vld [vmem:[%s6100_s3 + $0x1b8] ss:$12 sps:$4 sm:$0xff]  }
  0xc0   : > { %2085 = vmatprep.subr.bf16.mxu1 %v4584_v44  ;;  %v4634_v44 = vld [vmem:[%s6100_s3 + $0x1a0] ss:$12 sps:$4 sm:$0xff]  }
  0xc2   : > { %2045 = vmatpush1.bf16.msra.mxu0 %v4549_v45  ;;  %v4635_v45 = vld [vmem:[%s6100_s3 + $0x188] ss:$12 sps:$4 sm:$0xff]  }
  0xc3   : > { %2086 = vmatpush1.bf16.msra.mxu1 %v4582_v46  ;;  %2046 = vmatprep.subr.bf16.mxu0 %v4554_v47 }
  0xc4   : > { %2087 = vmatprep.subr.bf16.mxu1 %v4590_v48 }
  0xc6   : > { %2047 = vmatpush1.bf16.msra.mxu0 %v4552_v49 }
  0xc7   : > { %2088 = vmatpush1.bf16.msra.mxu1 %v4588_v50  ;;  %2048 = vmatprep.subr.bf16.mxu0 %v4557_v51 }
  0xc8   : > { %2089 = vmatprep.subr.bf16.mxu1 %v4596_v52 }
  0xca   : > { %2049 = vmatpush1.bf16.msra.mxu0 %v4555_v53 }
  0xcb   : > { %2090 = vmatpush1.bf16.msra.mxu1 %v4594_v54  ;;  %2050 = vmatprep.subr.bf16.mxu0 %v4560_v55 }
  0xcc   : > { %2091 = vmatprep.subr.bf16.mxu1 %v4602_v56 }
  0xce   : > { %2051 = vmatpush1.bf16.msra.mxu0 %v4558_v57 }
  0xcf   : > { %2092 = vmatpush1.bf16.msra.mxu1 %v4600_v59  ;;  %2052 = vmatprep.subr.bf16.mxu0 %v4563_v60 }
  0xd0   : > { %2093 = vmatprep.subr.bf16.mxu1 %v4608_v61 }
  0xd2   : > { %2053 = vmatpush1.bf16.msra.mxu0 %v4561_v62 }
  0xd3   : > { %2094 = vmatpush1.bf16.msra.mxu1 %v4606_v63  ;;  %2054 = vmatprep.subr.bf16.mxu0 %v4569_v0 }
  0xd4   : > { %4048 = vmatprep.subr.bf16.mxu1 %v4612_v1 }
  0xd6   : > { %2112 = vmatmul.mubr.bf16.vlgmr.msra.gmra.mxu1 %v5043_v36  ;;  %2055 = vmatpush2.bf16.msra.mxu0 %v4567_v3 }
  0xd7   : > { %4049 = vmatpush3.bf16.msra.mxu1 %v4613_v4  ;;  %2056 = vmatprep.subr.bf16.mxu0 %v4575_v5 }
  0xd8   : > { %4050 = vmatprep.subr.bf16.mxu1 %v4614_v6  ;;  %2152 = vmatprep.mubr.bf16.mxu1 %v5107_v58  ;;  %v4620_v58 = vld [vmem:[%s6100_s3 + $0x68] ss:$12 sps:$4 sm:$0xff]  }
  0xda   : > { %2057 = vmatpush2.bf16.msra.mxu0 %v4573_v7 }
  0xdb   : > { %4051 = vmatpush3.bf16.msra.mxu1 %v4615_v9  ;;  %2058 = vmatprep.subr.bf16.mxu0 %v4581_v10 }
  0xdc   : > { %4052 = vmatprep.subr.bf16.mxu1 %v4616_v12 }
  0xde   : > { %2059 = vmatpush2.bf16.msra.mxu0 %v4579_v13 }
  0xdf   : > { %4053 = vmatpush3.bf16.msra.mxu1 %v4617_v14  ;;  %2060 = vmatprep.subr.bf16.mxu0 %v4587_v15 }
  0xe0   : > { %4054 = vmatprep.subr.bf16.mxu1 %v4619_v16 }
  0xe2   : > { %2061 = vmatpush2.bf16.msra.mxu0 %v4585_v17 }
  0xe3   : > { %4055 = vmatpush3.bf16.msra.mxu1 %v4620_v58  ;;  %2062 = vmatprep.subr.bf16.mxu0 %v4593_v18 }
  0xe4   : > { %4056 = vmatprep.subr.bf16.mxu1 %v4622_v19 }
  0xe6   : > { %2063 = vmatpush2.bf16.msra.mxu0 %v4591_v20 }
  0xe7   : > { %4057 = vmatpush3.bf16.msra.mxu1 %v4623_v21  ;;  %2064 = vmatprep.subr.bf16.mxu0 %v4599_v22 }
  0xe8   : > { %4058 = vmatprep.subr.bf16.mxu1 %v4625_v23 }
  0xea   : > { %2065 = vmatpush2.bf16.msra.mxu0 %v4597_v24 }
  0xeb   : > { %4059 = vmatpush3.bf16.msra.mxu1 %v4626_v25  ;;  %2066 = vmatprep.subr.bf16.mxu0 %v4605_v26 }
  0xec   : > { %4060 = vmatprep.subr.bf16.mxu1 %v4628_v27 }
  0xee   : > { %2067 = vmatpush2.bf16.msra.mxu0 %v4603_v28 }
  0xef   : > { %4061 = vmatpush3.bf16.msra.mxu1 %v4629_v29  ;;  %2068 = vmatprep.subr.bf16.mxu0 %v4611_v30 }
  0xf0   : > { %4062 = vmatprep.subr.bf16.mxu1 %v4631_v31 }
  0xf2   : > { %2069 = vmatpush2.bf16.msra.mxu0 %v4609_v32 }
  0xf3   : > { %4063 = vmatpush3.bf16.msra.mxu1 %v4632_v33  ;;  %4174 = vmatprep.subr.bf16.mxu0 %v4838_v11 }
  0xf4   : > { %4194 = vmatprep.subr.bf16.mxu1 %v4838_v11 }
  0xf5   : > { %2071 = vmatmul.mubr.bf16.vlgmr.msra.gmra.mxu0 %v5145_v8 }
  0xf6   : > { %v826_v35 = vpop.f32.mrf.mxu1  ;;  %2153 = vmatmul.mubr.bf16.vlgmr.msra.gmra.mxu1 %v5145_v8  ;;  %4175 = vmatpush3.bf16.msra.mxu0 %v4618_v34  ;;  %v4624_v8 = vld [vmem:[%s6100_s3 + $0x200] ss:$12 sps:$4 sm:$0xff]  }
  0xf7   : > { %4190 = vmatprep.mubr.msk.bf16.mxu0 %vm4839_vm0, %v4838_v11  ;;  %4176 = vmatprep.subr.bf16.mxu0 %v4838_v11 }
  0xf8   : > { %v828_v38 = vpop.f32.mrf.mxu1  ;;  %4196 = vmatprep.mubr.msk.bf16.mxu1 %vm4839_vm0, %v4838_v11 }
  0xfa   : > { %v830_v39 = vpop.f32.mrf.mxu1  ;;  %4177 = vmatpush3.bf16.msra.mxu0 %v4621_v37 }
  0xfb   : > { %4178 = vmatprep.subr.bf16.mxu0 %v4838_v11 }
  0xfc   : > { %v831_v40 = vpop.f32.mrf.mxu1 }
  0xfe   : > { %4179 = vmatpush3.bf16.msra.mxu0 %v4624_v8 }
  0xff   : > { %4180 = vmatprep.subr.bf16.mxu0 %v4838_v11 }
 0x102   : > { %4181 = vmatpush3.bf16.msra.mxu0 %v4627_v41 }
 0x103   : > { %4182 = vmatprep.subr.bf16.mxu0 %v4838_v11 }
 0x106   : > { %4183 = vmatpush3.bf16.msra.mxu0 %v4630_v42 }
 0x107   : > { %4184 = vmatprep.subr.bf16.mxu0 %v4838_v11 }
 0x10a   : > { %4185 = vmatpush3.bf16.msra.mxu0 %v4633_v43 }
 0x10b   : > { %4186 = vmatprep.subr.bf16.mxu0 %v4838_v11 }
 0x10e   : > { %4187 = vmatpush3.bf16.msra.mxu0 %v4634_v44 }
 0x10f   : > { %4188 = vmatprep.subr.bf16.mxu0 %v4838_v11 }
 0x112   : > { %4189 = vmatpush3.bf16.msra.mxu0 %v4635_v45 }
 0x113   : > { %4242 = vmatprep.subr.bf16.mxu0 %v4838_v11 }
 0x115   : > { %v785_v46 = vpop.f32.mrf.mxu0  ;;  %4191 = vmatmul.mubr.bf16.vlgmr.msra.gmra.mxu0 %v5043_v36 }
 0x116   : > { %v4002_v47 = vpop.f32.mrf.mxu1  ;;  %v827_v48 = vadd.f32 %v826_v35, %v785_v46  ;;  %4244 = vmatprep.mubr.msk.bf16.mxu0 %vm4839_vm0, %v4838_v11 }
 0x117   : > { %v787_v49 = vpop.f32.mrf.mxu0 }
 0x118   : > { %v4003_v50 = vpop.f32.mrf.mxu1  ;;  %v913_v51 = vmul.f32 0.05103104, %v827_v48  ;;  %v5653_v52 = vadd.f32 %v828_v38, %v787_v49 }
 0x119   : > { %v4004_v53 = vadd.f32 %v4003_v50, %v4002_v47  ;;  %v789_v54 = vpop.f32.mrf.mxu0  ;;  %v2209_v50 = vlaneseq }
 0x11a   : > { %v4005_v55 = vpop.f32.mrf.mxu1  ;;  %v2200_v56 = vpack.c.bf16 %v913_v51, %v913_v51 }
 0x11b   : > { %v790_v57 = vpop.f32.mrf.mxu0  ;;  %v5683_v51 = vshrl.u32 %v2209_v50, 7 }
 0x11c   : > { %v4006_v59 = vpop.f32.mrf.mxu1  ;;  %2326 = vrot.lane.b32.xlu1 %v2200_v56, %s4840_s18 }
 0x135   : > { %v907_v60 = vpop.f32.mrf.mxu0 }
 0x136   : > { %v908_v36 = vadd.f32 %v4004_v53, %v907_v60  ;;  %v2212_v53 = vand.u32 127, %v2209_v50 }
 0x137   : > { %v4152_v61 = vpop.f32.mrf.mxu0 }
 0x138   : > { %v915_v26 = vmul.f32 0.05103104, %v908_v36  ;;  %vm5686_vm3 = vcmp.ge.s32.totalorder %v5683_v51, %v2212_v53 }
 0x139   : > { %v910_v62 = vpop.f32.mrf.mxu0 }
 0x13a   : > { %v5671_v27 = vpack.c.bf16 %v915_v26, %v915_v26 }
 0x13b   : > { %v4153_v63 = vpop.f32.mrf.mxu0 }
 0x155   : > { %v1471_v1 = vpop.f32.mrf.mxu0 }
 0x156   : > { %v1430_v0 = vpop.f32.mrf.mxu1 }
 0x157   : > { %v1472_v3 = vadd.f32 %v1471_v1, %v1430_v0  ;;  %v1473_v5 = vpop.f32.mrf.mxu0 }
 0x158   : > { %v1432_v4 = vpop.f32.mrf.mxu1 }
 0x159   : > { %v5656_v6 = vpack.c.bf16 %v1472_v3, %v1472_v3  ;;  %v5658_v7 = vadd.f32 %v1473_v5, %v1432_v4  ;;  %v1475_v10 = vpop.f32.mrf.mxu0 }
 0x15a   : > { %v1434_v9 = vpop.f32.mrf.mxu1 }
 0x15b   : > { %v2219_v12 = vsel %vm2214_vm1, %v5656_v6, 0  ;;  %v1476_v14 = vpop.f32.mrf.mxu0  ;;  %v2204_v26 = vpack.c.bf16 %v5658_v7, %v5658_v7 }
 0x15c   : > { %v1435_v13 = vpop.f32.mrf.mxu1  ;;  %4195 = vmatpush3.bf16.xpose.msra.mxu1 %v2219_v12 }
 0x15d   : > { %4200 = vmatprep.subr.bf16.mxu1 %v4838_v11 }
 0x163   : > { %4197 = vmatmul.mubr.msk.bf16.vlgmr.msra.gmra.mxu1 %vm2214_vm1, %v2200_v56 }
 0x164   : > { %4202 = vmatprep.mubr.msk.bf16.mxu1 %vm4839_vm0, %v4838_v11 }
 0x175   : > { %v4033_v15 = vpop.f32.mrf.mxu0 }
 0x176   : > { %v1552_v16 = vpop.f32.mrf.mxu1 }
 0x177   : > { %v4034_v17 = vpop.f32.mrf.mxu0 }
 0x178   : > { %v4172_v58 = vpop.f32.mrf.mxu1  ;;  %v4035_v18 = vadd.f32 %v4034_v17, %v4033_v15 }
 0x179   : > { %v4036_v20 = vpop.f32.mrf.mxu0 }
 0x17a   : > { %v1555_v19 = vpop.f32.mrf.mxu1  ;;  %v1553_v21 = vadd.f32 %v4035_v18, %v1552_v16 }
 0x17b   : > { %v4037_v23 = vpop.f32.mrf.mxu0 }
 0x17c   : > { %v4173_v22 = vpop.f32.mrf.mxu1  ;;  %v5666_v24 = vpack.c.bf16 %v1553_v21, %v1553_v21 }
 0x17e   : > { %v2681_v25 = vsel %vm2214_vm1, %v5666_v24, 0 }
 0x17f   : > { %4243 = vmatpush3.bf16.xpose.msra.mxu0 %v2681_v25  ;;  %v914_v25 = vmul.f32 0.05103104, %v5653_v52 }
 0x180   : > { %4254 = vmatprep.subr.bf16.mxu0 %v4838_v11 }
 0x186   : > { %4245 = vmatmul.mubr.msk.bf16.vlgmr.msra.gmra.mxu0 %vm2214_vm1, %v5671_v27 }
 0x187   : > { %4256 = vmatprep.mubr.msk.bf16.mxu0 %vm4839_vm0, %v4838_v11 }
 0x18e   : > { %v2327_v13 = vpop.permute.xlu1 %2326 }
 0x196   : > { %v2113_v28 = vpop.f32.mrf.mxu1 }
 0x198   : > { %v2115_v29 = vpop.f32.mrf.mxu1 }
 0x19a   : > { %v2117_v30 = vpop.f32.mrf.mxu1 }
 0x19c   : > { %v2118_v31 = vpop.f32.mrf.mxu1 }
 0x1b5   : > { %v2072_v32 = vpop.f32.mrf.mxu0 }
 0x1b6   : > { %v4064_v33 = vpop.f32.mrf.mxu1  ;;  %v2114_v34 = vadd.f32 %v2113_v28, %v2072_v32  ;;  %v2201_v28 = vpack.c.bf16 %v914_v25, %v914_v25 }
 0x1b7   : > { %v2074_v35 = vpop.f32.mrf.mxu0 }
 0x1b8   : > { %v4065_v37 = vpop.f32.mrf.mxu1  ;;  %v2206_v38 = vpack.c.bf16 %v2114_v34, %v2114_v34  ;;  %v5677_v39 = vadd.f32 %v2115_v29, %v2074_v35  ;;  %v2452_v34 = vsel %vm2214_vm1, %v2204_v26, 0 }
 0x1b9   : > { %v4066_v8 = vadd.f32 %v4065_v37, %v4064_v33  ;;  %v2076_v40 = vpop.f32.mrf.mxu0 }
 0x1ba   : > { %v4067_v41 = vpop.f32.mrf.mxu1  ;;  %v2278_v42 = vsel %vm2276_vm2, %v2206_v38, 0  ;;  %v5731_v52 = vpack.c.bf16 %v5677_v39, %v5677_v39 }
 0x1bb   : > { %4201 = vmatpush3.bf16.msra.mxu1 %v2278_v42  ;;  %v2077_v43 = vpop.f32.mrf.mxu0 }
 0x1bc   : > { %v4068_v44 = vpop.f32.mrf.mxu1  ;;  %4206 = vmatprep.subr.bf16.mxu1 %v4838_v11  ;;  %v2509_v7 = vsel %vm2276_vm2, %v5731_v52, 0 }
 0x1d5   : > { %v2194_v45 = vpop.f32.mrf.mxu0 }
 0x1d6   : > { %v5681_v46 = vadd.f32 %v4066_v8, %v2194_v45 }
 0x1d7   : > { %v4192_v47 = vpop.f32.mrf.mxu0 }
 0x1d8   : > { %v5753_v47 = vpack.c.bf16 %v5681_v46, %v5681_v46 }
 0x1d9   : > { %v2197_v48 = vpop.f32.mrf.mxu0 }
 0x1db   : > { %v4193_v49 = vpop.f32.mrf.mxu0 }
 0x223   : > { %v2255_v55 = vpop.f32.mrf.mxu1 }
 0x224   : > { %v2261_v56 = vsel %vm5686_vm3, %v2255_v55, -inf }
 0x225   : > { %v4198_v57 = vpop.f32.mrf.mxu1  ;;  %v2263_v59 = vsel %vm2262_vm4, %v2261_v56, -inf }
 0x226   : > { %2264 = vmax.xlane.f32.xlu0 %v2263_v59 }
 0x227   : > { %v2258_v60 = vpop.f32.mrf.mxu1 }
 0x229   : > { %v4199_v36 = vpop.f32.mrf.mxu1 }
 0x23c   : > { %2329 = vrot.lane.b32.xlu0 %v5656_v6, %s4840_s18 }
 0x240   : > { %2389 = vrot.lane.b32.xlu0 %v2206_v38, %s4840_s18 }
 0x246   : > { %v5696_v61 = vpop.f32.mrf.mxu0 }
 0x247   : > { %v5747_v44 = vsel %vm5686_vm3, %v5696_v61, -inf }
 0x248   : > { %v4246_v62 = vpop.f32.mrf.mxu0  ;;  %v2724_v45 = vsel %vm2262_vm4, %v5747_v44, -inf }
 0x24a   : > { %v2720_v63 = vpop.f32.mrf.mxu0 }
 0x24c   : > { %v4247_v0 = vpop.f32.mrf.mxu0 }
 0x2af   : > { %v2265_v1 = vpop.xlane.xlu0 %2264 }
 0x2b0   : > { %v2266_v3 = vsub.f32 %v2261_v56, %v2265_v1 }
 0x2b2   : > { %v2267_v4 = vmul.f32 1.442695, %v2266_v3 }
 0x2b3   : > { %v2330_v9 = vpop.permute.xlu0 %2329 }
 0x2b4   : > { %4735 = vpow2.f32 %v2267_v4  ;;  %v2335_v12 = vsel %vm2214_vm1, %v2330_v9, 0 }
 0x2b7   : > { %v2390_v6 = vpop.permute.xlu0 %2389 }
 0x2b8   : > { %v2395_v14 = vsel %vm2276_vm2, %v2390_v6, 0 }
 0x2c1   : > { %v5698_v5 = vpop.eup %4735 }
 0x2c2   : > { %v2272_v10 = vpack.c.bf16 %v5698_v5, %v5698_v5 }
 0x2c4   : > { %4203 = vmatmul.mubr.msk.bf16.vlgmr.msra.gmra.mxu1 %vm2262_vm4, %v2272_v10 }
 0x2c5   : > { %4207 = vmatpush3.bf16.xpose.msra.mxu1 %v2335_v12  ;;  %4208 = vmatprep.mubr.msk.bf16.mxu1 %vm4839_vm0, %v4838_v11 }
 0x2c6   : > { %4212 = vmatprep.subr.bf16.mxu1 %v4838_v11 }
 0x2cc   : > { %4209 = vmatmul.mubr.msk.bf16.vlgmr.msra.gmra.mxu1 %vm2214_vm1, %v2327_v13 }
 0x2cd   : > { %4213 = vmatpush3.bf16.msra.mxu1 %v2395_v14  ;;  %4214 = vmatprep.mubr.msk.bf16.mxu1 %vm4839_vm0, %v4838_v11 }
 0x2ce   : > { %4218 = vmatprep.subr.bf16.mxu1 %v4838_v11 }
 0x384   : > { %v5712_v15 = vpop.f32.mrf.mxu1 }
 0x386   : > { %v4204_v16 = vpop.f32.mrf.mxu1 }
 0x388   : > { %v2317_v17 = vpop.f32.mrf.mxu1 }
 0x38a   : > { %v4205_v58 = vpop.f32.mrf.mxu1 }
 0x38c   : > { %v2371_v18 = vpop.f32.mrf.mxu1 }
 0x38d   : > { %v2377_v19 = vsel %vm5686_vm3, %v2371_v18, -inf }
 0x38e   : > { %v4210_v20 = vpop.f32.mrf.mxu1  ;;  %v2378_v21 = vsel %vm2262_vm4, %v2377_v19, -inf }
 0x38f   : > { %2379 = vmax.xlane.f32.xlu1 %v2378_v21 }
 0x390   : > { %v2374_v22 = vpop.f32.mrf.mxu1 }
 0x392   : > { %v4211_v23 = vpop.f32.mrf.mxu1 }
 0x3a0   : > { %2559 = vrot.lane.b32.xlu1 %v2204_v26, %s4840_s18 }
 0x3a4   : > { %2556 = vrot.lane.b32.xlu1 %v2201_v28, %s4840_s18 }
 0x3a8   : > { %2785 = vrot.lane.b32.xlu1 %v5671_v27, %s4840_s18 }
 0x418   : > { %v2380_v29 = vpop.xlane.xlu1 %2379 }
 0x419   : > { %v2381_v30 = vsub.f32 %v2377_v19, %v2380_v29 }
 0x41b   : > { %v2382_v31 = vmul.f32 1.442695, %v2381_v30 }
 0x41d   : > { %4737 = vpow2.f32 %v2382_v31 }
 0x42a   : > { %v4738_v32 = vpop.eup %4737 }
 0x42b   : > { %v2387_v33 = vpack.c.bf16 %v4738_v32, %v4738_v32  ;;  %v2384_v48 = vsel %vm2262_vm4, %v4738_v32, 0.0 }
 0x42d   : > { %4215 = vmatmul.mubr.msk.bf16.vlgmr.msra.gmra.mxu1 %vm2262_vm4, %v2387_v33 }
 0x42e   : > { %4219 = vmatpush3.bf16.xpose.msra.mxu1 %v2452_v34  ;;  %4220 = vmatprep.mubr.msk.bf16.mxu1 %vm4839_vm0, %v4838_v11 }
 0x42f   : > { %4224 = vmatprep.subr.bf16.mxu1 %v4838_v11 }
 0x435   : > { %4221 = vmatmul.mubr.msk.bf16.vlgmr.msra.gmra.mxu1 %vm2214_vm1, %v2201_v28 }
 0x436   : > { %4225 = vmatpush3.bf16.msra.mxu1 %v2509_v7  ;;  %4226 = vmatprep.mubr.msk.bf16.mxu1 %vm4839_vm0, %v4838_v11 }
 0x437   : > { %4230 = vmatprep.subr.bf16.mxu1 %v4838_v11 }
 0x4ed   : > { %v2431_v27 = vpop.f32.mrf.mxu1 }
 0x4ef   : > { %v4216_v35 = vpop.f32.mrf.mxu1 }
 0x4f1   : > { %v2434_v37 = vpop.f32.mrf.mxu1 }
 0x4f3   : > { %v4217_v38 = vpop.f32.mrf.mxu1 }
 0x4f5   : > { %v2488_v8 = vpop.f32.mrf.mxu1 }
 0x4f6   : > { %v2494_v39 = vsel %vm5686_vm3, %v2488_v8, -inf }
 0x4f7   : > { %v4222_v40 = vpop.f32.mrf.mxu1  ;;  %v2495_v41 = vsel %vm2262_vm4, %v2494_v39, -inf }
 0x4f8   : > { %2496 = vmax.xlane.f32.xlu0 %v2495_v41 }
 0x4f9   : > { %v2491_v42 = vpop.f32.mrf.mxu1 }
 0x4fb   : > { %v4223_v43 = vpop.f32.mrf.mxu1 }
 0x4fc   : > { %v2738_v43 = vsel %vm2276_vm2, %v5753_v47, 0 }
 0x50e   : > { %2788 = vrot.lane.b32.xlu0 %v5666_v24, %s4840_s18  ;;  %v2560_v24 = vpop.permute.xlu1 %2559 }
 0x50f   : > { %v2565_v61 = vsel %vm2214_vm1, %v2560_v24, 0 }
 0x512   : > { %v2557_v57 = vpop.permute.xlu1 %2556 }
 0x516   : > { %v2786_v59 = vpop.permute.xlu1 %2785 }
 0x52d   : > { %2725 = vmax.xlane.f32.xlu0 %v2724_v45  ;;  %v2269_v45 = vsel %vm2262_vm4, %v5698_v5, 0.0  ;;  %v4636_v5 = vld [vmem:[%s6101_s4 + $0xa8] ss:$12 sps:$4 sm:$0xff]  }
 0x543   : > { %2848 = vrot.lane.b32.xlu0 %v5753_v47, %s4840_s18 }
 0x562   : > { %2385 = vadd.xlane.f32.xlu0 %v2384_v48 }
 0x581   : > { %v2497_v49 = vpop.xlane.xlu0 %2496 }
 0x582   : > { %v2498_v50 = vsub.f32 %v2494_v39, %v2497_v49  ;;  %v4638_v49 = vld [vmem:[%s6101_s4 + $0xac] ss:$12 sps:$4 sm:$0xff]  }
 0x584   : > { %v2499_v53 = vmul.f32 1.442695, %v2498_v50  ;;  %v4641_v50 = vld [vmem:[%s6101_s4 + $0x94] ss:$12 sps:$4 sm:$0xff]  }
 0x585   : > { %v2789_v55 = vpop.permute.xlu0 %2788 }
 0x586   : > { %4739 = vpow2.f32 %v2499_v53  ;;  %v2794_v56 = vsel %vm2214_vm1, %v2789_v55, 0  ;;  %v4639_v53 = vld [vmem:[%s6101_s4 + $0x90] ss:$12 sps:$4 sm:$0xff]   ;;  %v4657_v55 = vld [vmem:[%s6101_s4 + $0x228] ss:$12 sps:$4 sm:$0xff]  }
 0x587   : > { %4255 = vmatpush3.bf16.xpose.msra.mxu0 %v2794_v56  ;;  %v4659_v56 = vld [vmem:[%s6101_s4 + $0x22c] ss:$12 sps:$4 sm:$0xff]  }
 0x588   : > { %3416 = vmatprep.subr.bf16.mxu0 %v4638_v49  ;;  %v4704_v49 = vld [vmem:[%s6101_s4 + $0xdc] ss:$12 sps:$4 sm:$0xff]  }
 0x58e   : > { %4257 = vmatmul.mubr.msk.bf16.vlgmr.msra.gmra.mxu0 %vm2214_vm1, %v2786_v59  ;;  %v4642_v59 = vld [vmem:[%s6101_s4 + $0x78] ss:$12 sps:$4 sm:$0xff]  }
 0x58f   : > { %3417 = vmatpush1.bf16.msra.mxu0 %v4636_v5  ;;  %v4702_v5 = vld [vmem:[%s6101_s4 + $0xd8] ss:$12 sps:$4 sm:$0xff]  }
 0x590   : > { %3418 = vmatprep.subr.bf16.mxu0 %v4641_v50  ;;  %v4705_v50 = vld [vmem:[%s6101_s4 + $0x170] ss:$12 sps:$4 sm:$0xff]  }
 0x593   : > { %v4740_v46 = vpop.eup %4739  ;;  %3419 = vmatpush1.bf16.msra.mxu0 %v4639_v53  ;;  %v4708_v53 = vld [vmem:[%s6101_s4 + $0xc4] ss:$12 sps:$4 sm:$0xff]  }
 0x594   : > { %v2501_v60 = vsel %vm2262_vm4, %v4740_v46, 0.0  ;;  %v2504_v36 = vpack.c.bf16 %v4740_v46, %v4740_v46  ;;  %v4647_v46 = vld [vmem:[%s6101_s4 + $0x64] ss:$12 sps:$4 sm:$0xff]  }
 0x595   : > { %2502 = vadd.xlane.f32.xlu0 %v2501_v60  ;;  %v4663_v60 = vld [vmem:[%s6101_s4 + $0x210] ss:$12 sps:$4 sm:$0xff]  }
 0x596   : > { %4227 = vmatmul.mubr.msk.bf16.vlgmr.msra.gmra.mxu1 %vm2262_vm4, %v2504_v36  ;;  %v4671_v36 = vld [vmem:[%s6101_s4 + $0x1fc] ss:$12 sps:$4 sm:$0xff]  }
 0x597   : > { %4231 = vmatpush3.bf16.xpose.msra.mxu1 %v2565_v61  ;;  %4232 = vmatprep.mubr.msk.bf16.mxu1 %vm4839_vm0, %v4838_v11  ;;  %v4645_v61 = vld [vmem:[%s6101_s4 + $0x60] ss:$12 sps:$4 sm:$0xff]  }
 0x598   : > { %4236 = vmatprep.subr.bf16.mxu1 %v4838_v11 }
 0x59e   : > { %4233 = vmatmul.mubr.msk.bf16.vlgmr.msra.gmra.mxu1 %vm2214_vm1, %v2557_v57  ;;  %v4665_v57 = vld [vmem:[%s6101_s4 + $0x214] ss:$12 sps:$4 sm:$0xff]  }
 0x59f   : > { %4238 = vmatprep.mubr.msk.bf16.mxu1 %vm4839_vm0, %v4838_v11 }
 0x5b6   : > { %v2726_v62 = vpop.xlane.xlu0 %2725 }
 0x5b7   : > { %v2727_v34 = vsub.f32 %v5747_v44, %v2726_v62  ;;  %v4650_v62 = vld [vmem:[%s6101_s4 + $0x4c] ss:$12 sps:$4 sm:$0xff]  }
 0x5b9   : > { %v2728_v54 = vmul.f32 1.442695, %v2727_v34 }
 0x5ba   : > { %v5769_v63 = vpop.permute.xlu0 %2848 }
 0x5bb   : > { %v2854_v24 = vsel %vm2276_vm2, %v5769_v63, 0  ;;  %v4669_v63 = vld [vmem:[%s6101_s4 + $0x1f8] ss:$12 sps:$4 sm:$0xff]  }
 0x5eb   : > { %v2386_v0 = vpop.xlane.xlu0 %2385 }
 0x5ec   : > { %4741 = vrcp.f32 %v2386_v0  ;;  %v4677_v0 = vld [vmem:[%s6101_s4 + $0x1e4] ss:$12 sps:$4 sm:$0xff]  }
 0x5f9   : > { %v4742_v1 = vpop.eup %4741 }
 0x5fa   : > { %v2438_v3 = vmul.f32 %v4742_v1, %v2431_v27  ;;  %v4648_v1 = vld [vmem:[%s6101_s4 + $0x48] ss:$12 sps:$4 sm:$0xff]  }
 0x5fc   : > { %v3983_v4 = vpack.c.bf16 %v2438_v3, %v2438_v3  ;;  %v4653_v3 = vld [vmem:[%s6101_s4 + $0x34] ss:$12 sps:$4 sm:$0xff]  }
 0x5fe   : > { %2443 = vrot.lane.b32.xlu0 %v3983_v4, %s4840_s18  ;;  %v4675_v4 = vld [vmem:[%s6101_s4 + $0x1e0] ss:$12 sps:$4 sm:$0xff]  }
 0x61e   : > { %v2503_v9 = vpop.xlane.xlu0 %2502 }
 0x61f   : > { %4743 = vrcp.f32 %v2503_v9  ;;  %v4683_v9 = vld [vmem:[%s6101_s4 + $0x1cc] ss:$12 sps:$4 sm:$0xff]  }
 0x62c   : > { %v4744_v17 = vpop.eup %4743 }
 0x64e   : > { %v2830_v10 = vpop.f32.mrf.mxu0 }
 0x64f   : > { %v2836_v12 = vsel %vm5686_vm3, %v2830_v10, -inf  ;;  %v4651_v10 = vld [vmem:[%s6101_s4 + $0x30] ss:$12 sps:$4 sm:$0xff]  }
 0x650   : > { %v4258_v6 = vpop.f32.mrf.mxu0  ;;  %v2837_v13 = vsel %vm2262_vm4, %v2836_v12, -inf }
 0x651   : > { %2838 = vmax.xlane.f32.xlu1 %v2837_v13  ;;  %v4681_v6 = vld [vmem:[%s6101_s4 + $0x1c8] ss:$12 sps:$4 sm:$0xff]  }
 0x652   : > { %v2833_v14 = vpop.f32.mrf.mxu0  ;;  %v4689_v13 = vld [vmem:[%s6101_s4 + $0x1b4] ss:$12 sps:$4 sm:$0xff]  }
 0x653   : > { %v4654_v14 = vld [vmem:[%s6101_s4 + $0x18] ss:$12 sps:$4 sm:$0xff]  }
 0x654   : > { %v4259_v16 = vpop.f32.mrf.mxu0 }
 0x655   : > { %v4662_v16 = vld [vmem:[%s6101_s4 + $0x4] ss:$12 sps:$4 sm:$0xff]  }
 0x656   : > { %v2545_v58 = vpop.f32.mrf.mxu1 }
 0x657   : > { %v2552_v18 = vmul.f32 %v4744_v17, %v2545_v58  ;;  %v4687_v17 = vld [vmem:[%s6101_s4 + $0x1b0] ss:$12 sps:$4 sm:$0xff]   ;;  %v4660_v58 = vld [vmem:[%s6101_s4] ss:$12 sps:$4 sm:$0xff]  }
 0x658   : > { %v4228_v19 = vpop.f32.mrf.mxu1 }
 0x659   : > { %v2553_v20 = vpack.c.bf16 %v2552_v18, %v2552_v18  ;;  %v4668_v18 = vld [vmem:[%s6101_s4 + $0x16c] ss:$12 sps:$4 sm:$0xff]   ;;  %v4666_v19 = vld [vmem:[%s6101_s4 + $0x168] ss:$12 sps:$4 sm:$0xff]  }
 0x65a   : > { %v2548_v21 = vpop.f32.mrf.mxu1 }
 0x65b   : > { %2554 = vst.msk [vmem:[#allocation2 + $0x4] sm:$0xf] %vm2323_vm5, %v2553_v20  ;;  %v4674_v20 = vld [vmem:[%s6101_s4 + $0x154] ss:$12 sps:$4 sm:$0xff]   ;;  %v4672_v21 = vld [vmem:[%s6101_s4 + $0x150] ss:$12 sps:$4 sm:$0xff]  }
 0x65c   : > { %v4229_v22 = vpop.f32.mrf.mxu1 }
 0x65d   : > { %v4680_v22 = vld [vmem:[%s6101_s4 + $0x13c] ss:$12 sps:$4 sm:$0xff]  }
 0x65e   : > { %v2601_v23 = vpop.f32.mrf.mxu1 }
 0x65f   : > { %v2607_v25 = vsel %vm5686_vm3, %v2601_v23, -inf  ;;  %v4678_v23 = vld [vmem:[%s6101_s4 + $0x138] ss:$12 sps:$4 sm:$0xff]  }
 0x660   : > { %v4234_v26 = vpop.f32.mrf.mxu1  ;;  %v2608_v28 = vsel %vm2262_vm4, %v2607_v25, -inf }
 0x661   : > { %2609 = vmax.xlane.f32.xlu1 %v2608_v28  ;;  %v4684_v28 = vld [vmem:[%s6101_s4 + $0x120] ss:$12 sps:$4 sm:$0xff]  }
 0x662   : > { %v2604_v29 = vpop.f32.mrf.mxu1 }
 0x663   : > { %v4692_v29 = vld [vmem:[%s6101_s4 + $0x10c] ss:$12 sps:$4 sm:$0xff]  }
 0x664   : > { %v4235_v30 = vpop.f32.mrf.mxu1 }
 0x672   : > { %2619 = vrot.lane.b32.xlu1 %v5731_v52, %s4840_s18 }
 0x6da   : > { %v2839_v31 = vpop.xlane.xlu1 %2838 }
 0x6db   : > { %v2840_v32 = vsub.f32 %v2836_v12, %v2839_v31  ;;  %v4656_v12 = vld [vmem:[%s6101_s4 + $0x1c] ss:$12 sps:$4 sm:$0xff]  }
 0x6dc   : > { %v4690_v31 = vld [vmem:[%s6101_s4 + $0x108] ss:$12 sps:$4 sm:$0xff]  }
 0x6dd   : > { %v2841_v33 = vmul.f32 1.442695, %v2840_v32 }
 0x6df   : > { %4745 = vpow2.f32 %v2841_v33 }
 0x6ea   : > { %v2610_v7 = vpop.xlane.xlu1 %2609 }
 0x6eb   : > { %v2611_v27 = vsub.f32 %v2607_v25, %v2610_v7  ;;  %v4686_v25 = vld [vmem:[%s6101_s4 + $0x124] ss:$12 sps:$4 sm:$0xff]  }
 0x6ec   : > { %v4746_v35 = vpop.eup %4745 }
 0x6ed   : > { %v2612_v37 = vmul.f32 1.442695, %v2611_v27  ;;  %v2843_v38 = vsel %vm2262_vm4, %v4746_v35, 0.0  ;;  %v2846_v47 = vpack.c.bf16 %v4746_v35, %v4746_v35  ;;  %v2444_v35 = vpop.permute.xlu0 %2443 }
 0x6ee   : > { %2844 = vadd.xlane.f32.xlu1 %v2843_v38  ;;  %v2620_v8 = vpop.permute.xlu1 %2619 }
 0x6ef   : > { %4747 = vpow2.f32 %v2612_v37  ;;  %v2625_v39 = vsel %vm2276_vm2, %v2620_v8, 0 }
 0x6f0   : > { %4237 = vmatpush3.bf16.msra.mxu1 %v2625_v39  ;;  %4749 = vpow2.f32 %v2728_v54  ;;  %v4695_v39 = vld [vmem:[%s6101_s4 + $0x19c] ss:$12 sps:$4 sm:$0xff]  }
 0x6f1   : > { %4248 = vmatprep.subr.bf16.mxu1 %v4838_v11 }
 0x6fc   : > { %v4748_v52 = vpop.eup %4747 }
 0x6fd   : > { %v2614_v40 = vsel %vm2262_vm4, %v4748_v52, 0.0  ;;  %v2617_v41 = vpack.c.bf16 %v4748_v52, %v4748_v52  ;;  %v4750_v42 = vpop.eup %4749 }
 0x6fe   : > { %2615 = vadd.xlane.f32.xlu1 %v2614_v40  ;;  %v2730_v44 = vsel %vm2262_vm4, %v4750_v42, 0.0  ;;  %v2733_v48 = vpack.c.bf16 %v4750_v42, %v4750_v42  ;;  %v4693_v40 = vld [vmem:[%s6101_s4 + $0x198] ss:$12 sps:$4 sm:$0xff]   ;;  %v4698_v42 = vld [vmem:[%s6101_s4 + $0xf4] ss:$12 sps:$4 sm:$0xff]  }
 0x6ff   : > { %4239 = vmatmul.mubr.msk.bf16.vlgmr.msra.gmra.mxu1 %vm2262_vm4, %v2617_v41  ;;  %v4696_v41 = vld [vmem:[%s6101_s4 + $0xf0] ss:$12 sps:$4 sm:$0xff]  }
 0x700   : > { %4249 = vmatpush3.bf16.msra.mxu1 %v2738_v43  ;;  %4250 = vmatprep.mubr.msk.bf16.mxu1 %vm4839_vm0, %v4838_v11 }
 0x701   : > { %4260 = vmatprep.subr.bf16.mxu1 %v4838_v11 }
 0x702   : > { %2731 = vadd.xlane.f32.xlu1 %v2730_v44 }
 0x706   : > { %2270 = vadd.xlane.f32.xlu1 %v2269_v45 }
 0x707   : > { %4251 = vmatmul.mubr.msk.bf16.vlgmr.msra.gmra.mxu1 %vm2262_vm4, %v2733_v48  ;;  %v4701_v48 = vld [vmem:[%s6101_s4 + $0x184] ss:$12 sps:$4 sm:$0xff]  }
 0x708   : > { %4261 = vmatpush3.bf16.msra.mxu1 %v2854_v24  ;;  %4262 = vmatprep.mubr.msk.bf16.mxu1 %vm4839_vm0, %v4838_v11 }
 0x709   : > { %3457 = vmatprep.subr.bf16.mxu1 %v4659_v56 }
 0x70f   : > { %4263 = vmatmul.mubr.msk.bf16.vlgmr.msra.gmra.mxu1 %vm2262_vm4, %v2846_v47  ;;  %v4699_v47 = vld [vmem:[%s6101_s4 + $0x180] ss:$12 sps:$4 sm:$0xff]  }
 0x710   : > { %3489 = vmatprep.mubr.bf16.mxu1 %v4837_v2  ;;  %v4644_v2 = vld [vmem:[%s6101_s4 + $0x7c] ss:$12 sps:$4 sm:$0xff]   ;;  %3458 = vmatpush1.bf16.msra.mxu1 %v4657_v55  ;;  %v4706_v55 = vld [vmem:[%s6101_s4 + $0xc0] ss:$12 sps:$4 sm:$0xff]  }
 0x711   : > { %3420 = vmatprep.subr.bf16.mxu0 %v4644_v2  ;;  %3459 = vmatprep.subr.bf16.mxu1 %v4665_v57 }
 0x712   : > { %3421 = vmatpush1.bf16.msra.mxu0 %v4642_v59 }
 0x713   : > { %3422 = vmatprep.subr.bf16.mxu0 %v4647_v46 }
 0x714   : > { %3460 = vmatpush1.bf16.msra.mxu1 %v4663_v60 }
 0x715   : > { %3461 = vmatprep.subr.bf16.mxu1 %v4671_v36 }
 0x716   : > { %3423 = vmatpush1.bf16.msra.mxu0 %v4645_v61 }
 0x717   : > { %3424 = vmatprep.subr.bf16.mxu0 %v4650_v62 }
 0x718   : > { %3462 = vmatpush1.bf16.msra.mxu1 %v4669_v63 }
 0x719   : > { %3463 = vmatprep.subr.bf16.mxu1 %v4677_v0 }
 0x71a   : > { %3425 = vmatpush1.bf16.msra.mxu0 %v4648_v1 }
 0x71b   : > { %3426 = vmatprep.subr.bf16.mxu0 %v4653_v3 }
 0x71c   : > { %3464 = vmatpush1.bf16.msra.mxu1 %v4675_v4  ;;  %v4710_v4 = vld [vmem:[%s6101_s4 + $0xb0] ss:$12 sps:$4 sm:$0xff]  }
 0x71d   : > { %3465 = vmatprep.subr.bf16.mxu1 %v4683_v9 }
 0x71e   : > { %3427 = vmatpush1.bf16.msra.mxu0 %v4651_v10  ;;  %v4711_v10 = vld [vmem:[%s6101_s4 + $0x158] ss:$12 sps:$4 sm:$0xff]  }
 0x71f   : > { %3428 = vmatprep.subr.bf16.mxu0 %v4656_v12  ;;  %v4714_v12 = vld [vmem:[%s6101_s4 + $0x98] ss:$12 sps:$4 sm:$0xff]  }
 0x720   : > { %3466 = vmatpush1.bf16.msra.mxu1 %v4681_v6 }
 0x721   : > { %3467 = vmatprep.subr.bf16.mxu1 %v4689_v13 }
 0x722   : > { %3429 = vmatpush1.bf16.msra.mxu0 %v4654_v14 }
 0x723   : > { %3430 = vmatprep.subr.bf16.mxu0 %v4662_v16  ;;  %v4715_v16 = vld [vmem:[%s6101_s4 + $0x230] ss:$12 sps:$4 sm:$0xff]  }
 0x724   : > { %3468 = vmatpush1.bf16.msra.mxu1 %v4687_v17  ;;  %v4716_v17 = vld [vmem:[%s6101_s4 + $0x140] ss:$12 sps:$4 sm:$0xff]  }
 0x725   : > { %3469 = vmatprep.subr.bf16.mxu1 %v4695_v39 }
 0x726   : > { %3431 = vmatpush1.bf16.msra.mxu0 %v4660_v58  ;;  %v4717_v58 = vld [vmem:[%s6101_s4 + $0x80] ss:$12 sps:$4 sm:$0xff]  }
 0x727   : > { %3432 = vmatprep.subr.bf16.mxu0 %v4668_v18  ;;  %v4719_v18 = vld [vmem:[%s6101_s4 + $0x128] ss:$12 sps:$4 sm:$0xff]  }
 0x728   : > { %3470 = vmatpush1.bf16.msra.mxu1 %v4693_v40 }
 0x729   : > { %3471 = vmatprep.subr.bf16.mxu1 %v4701_v48 }
 0x72a   : > { %3433 = vmatpush2.bf16.msra.mxu0 %v4666_v19  ;;  %v4718_v19 = vld [vmem:[%s6101_s4 + $0x218] ss:$12 sps:$4 sm:$0xff]  }
 0x72b   : > { %3434 = vmatprep.subr.bf16.mxu0 %v4674_v20  ;;  %v4720_v20 = vld [vmem:[%s6101_s4 + $0x68] ss:$12 sps:$4 sm:$0xff]  }
 0x72c   : > { %3472 = vmatpush1.bf16.msra.mxu1 %v4699_v47  ;;  %v3016_v47 = vsub.s32 2, %v5683_v51 }
 0x72d   : > { %4103 = vmatprep.subr.bf16.mxu1 %v4705_v50 }
 0x72e   : > { %3435 = vmatpush2.bf16.msra.mxu0 %v4672_v21  ;;  %v4722_v21 = vld [vmem:[%s6101_s4 + $0x110] ss:$12 sps:$4 sm:$0xff]  }
 0x72f   : > { %3436 = vmatprep.subr.bf16.mxu0 %v4680_v22  ;;  %v4721_v22 = vld [vmem:[%s6101_s4 + $0x200] ss:$12 sps:$4 sm:$0xff]  }
 0x732   : > { %3437 = vmatpush2.bf16.msra.mxu0 %v4678_v23  ;;  %v4723_v23 = vld [vmem:[%s6101_s4 + $0x50] ss:$12 sps:$4 sm:$0xff]  }
 0x733   : > { %3438 = vmatprep.subr.bf16.mxu0 %v4686_v25  ;;  %v4725_v25 = vld [vmem:[%s6101_s4 + $0xf8] ss:$12 sps:$4 sm:$0xff]  }
 0x736   : > { %3439 = vmatpush2.bf16.msra.mxu0 %v4684_v28  ;;  %v4726_v28 = vld [vmem:[%s6101_s4 + $0x38] ss:$12 sps:$4 sm:$0xff]  }
 0x737   : > { %3440 = vmatprep.subr.bf16.mxu0 %v4692_v29  ;;  %v4728_v29 = vld [vmem:[%s6101_s4 + $0xe0] ss:$12 sps:$4 sm:$0xff]  }
 0x73a   : > { %3441 = vmatpush2.bf16.msra.mxu0 %v4690_v31  ;;  %v4729_v31 = vld [vmem:[%s6101_s4 + $0x20] ss:$12 sps:$4 sm:$0xff]  }
 0x73b   : > { %3442 = vmatprep.subr.bf16.mxu0 %v4698_v42 }
 0x73e   : > { %3443 = vmatpush2.bf16.msra.mxu0 %v4696_v41 }
 0x73f   : > { %3444 = vmatprep.subr.bf16.mxu0 %v4704_v49 }
 0x742   : > { %3445 = vmatpush2.bf16.msra.mxu0 %v4702_v5 }
 0x743   : > { %3446 = vmatprep.subr.bf16.mxu0 %v4708_v53 }
 0x746   : > { %3447 = vmatpush2.bf16.msra.mxu0 %v4706_v55 }
 0x747   : > { %4266 = vmatprep.subr.bf16.mxu0 %v4838_v11 }
 0x777   : > { %v2845_v26 = vpop.xlane.xlu1 %2844 }
 0x787   : > { %v2616_v30 = vpop.xlane.xlu1 %2615 }
 0x78b   : > { %v2732_v32 = vpop.xlane.xlu1 %2731 }
 0x78f   : > { %v2271_v33 = vpop.xlane.xlu1 %2270 }
 0x790   : > { %4751 = vrcp.f32 %v2271_v33  ;;  %v4730_v33 = vld [vmem:[%s6101_s4 + $0x1b8] ss:$12 sps:$4 sm:$0xff]  }
 0x791   : > { %4753 = vrcp.f32 %v2732_v32  ;;  %v4731_v32 = vld [vmem:[%s6101_s4 + $0xc8] ss:$12 sps:$4 sm:$0xff]  }
 0x792   : > { %4755 = vrcp.f32 %v2845_v26  ;;  %v4724_v26 = vld [vmem:[%s6101_s4 + $0x1e8] ss:$12 sps:$4 sm:$0xff]  }
 0x793   : > { %4757 = vrcp.f32 %v2616_v30  ;;  %v4727_v30 = vld [vmem:[%s6101_s4 + $0x1d0] ss:$12 sps:$4 sm:$0xff]  }
 0x79d   : > { %v4752_v34 = vpop.eup %4751 }
 0x79e   : > { %v2321_v7 = vmul.f32 %v4752_v34, %v5712_v15  ;;  %v4754_v52 = vpop.eup %4753  ;;  %v4732_v34 = vld [vmem:[%s6101_s4 + $0x8] ss:$12 sps:$4 sm:$0xff]  }
 0x79f   : > { %v4756_v56 = vpop.eup %4755 }
 0x7a0   : > { %v2322_v27 = vpack.c.bf16 %v2321_v7, %v2321_v7  ;;  %v4758_v46 = vpop.eup %4757  ;;  %v4733_v7 = vld [vmem:[%s6101_s4 + $0x1a0] ss:$12 sps:$4 sm:$0xff]  }
 0x7a2   : > { %2324 = vst.msk [vmem:[#allocation2] sm:$0xf] %vm2323_vm5, %v2322_v27  ;;  %v4734_v27 = vld [vmem:[%s6101_s4 + $0x188] ss:$12 sps:$4 sm:$0xff]  }
 0x7a3   : > { %2447 = vst.msk [vmem:[#allocation2] sm:$0xf] %vm2446_vm6, %v2444_v35  ;;  %v3008_v35 = vsub.s32 0, %v5683_v51 }
 0x7bf   : > { %v2661_v54 = vpop.f32.mrf.mxu1 }
 0x7c0   : > { %v2668_v36 = vmul.f32 %v4758_v46, %v2661_v54 }
 0x7c1   : > { %v4240_v37 = vpop.f32.mrf.mxu1 }
 0x7c2   : > { %v3984_v0 = vpack.c.bf16 %v2668_v36, %v2668_v36  ;;  %v3004_v37 = vld [vmem:[%s6102_s5] sm:$0x7] }
 0x7c3   : > { %v2664_v38 = vpop.f32.mrf.mxu1  ;;  %v3009_v39 = vrot.slane %v3004_v37, %v3008_v35  ;;  %v3017_v49 = vrot.slane %v3004_v37, %v3016_v47 }
 0x7c4   : > { %v3012_v38 = vsub.s32 1, %v5683_v51 }
 0x7c5   : > { %v4241_v8 = vpop.f32.mrf.mxu1 }
 0x7c7   : > { %v2774_v15 = vpop.f32.mrf.mxu1 }
 0x7c8   : > { %v2781_v43 = vmul.f32 %v4754_v52, %v2774_v15  ;;  %v3013_v15 = vrot.slane %v3004_v37, %v3012_v38 }
 0x7c9   : > { %v4252_v44 = vpop.f32.mrf.mxu1 }
 0x7ca   : > { %v2782_v45 = vpack.c.bf16 %v2781_v43, %v2781_v43 }
 0x7cb   : > { %v2777_v24 = vpop.f32.mrf.mxu1 }
 0x7cc   : > { %2783 = vst.msk [vmem:[#allocation2 + $0x8] sm:$0xf] %vm2323_vm5, %v2782_v45 }
 0x7cd   : > { %v4253_v2 = vpop.f32.mrf.mxu1 }
 0x7cf   : > { %v2890_v57 = vpop.f32.mrf.mxu1 }
 0x7d0   : > { %v2897_v59 = vmul.f32 %v4756_v56, %v2890_v57 }
 0x7d1   : > { %v4264_v60 = vpop.f32.mrf.mxu1 }
 0x7d2   : > { %v3985_v61 = vpack.c.bf16 %v2897_v59, %v2897_v59 }
 0x7d3   : > { %v2893_v62 = vpop.f32.mrf.mxu1 }
 0x7d4   : > { %2902 = vrot.lane.b32.xlu1 %v3985_v61, %s4840_s18 }
 0x7d5   : > { %v4265_v63 = vpop.f32.mrf.mxu1 }
 0x7d8   : > { %2673 = vrot.lane.b32.xlu1 %v3984_v0, %s4840_s18  ;;  %s256_s18 = sand.u32 1, %s4819_s22  }
 0x7d9   : > { %s4286_s20 = smul.u32 24, %s256_s18  ;;  %s3582_s24 = scalar_lea.sflag [#allocation4], %s256_s18 }
 0x7db   : > { %s258_s27 = scalar_lea.vmem [#allocation3], %s4286_s20 }
 0x7dc   : > { %s3598_s8 = sshll.u32 %s258_s27, 4  ;;  %s6051_s8 = int_to_ptr.vmem [resolvable:$true] %s3598_s8 }
 0x7dd   : > { %s4759_s14 = scalar_lea.vmem %s6051_s8, 384  ;;  %p4766_p1 = scmp.lt.s32.totalorder %s6051_s8, %s4764_s19 }
 0x7de   : > { %p4760_p12 = scmp.ne.s32.totalorder %s6051_s8, %s4759_s14  ;;  %p4767_p2 = scmp.lt.s32.totalorder %s4765_s16, %s4759_s14 }
 0x7e0   : > { %p4761_p13 = pnand %p4760_p12, %p4917_p4  ;;  %p4768_p3 = por %p4767_p2, %p4766_p1 }
 0x7e2   : > { %p4762_p0 = pneg %p4761_p13 }
 0x7e4   : > { %p4769_p5 = pnand %p4768_p3, %p4762_p0 }
 0x846   : > { %v2903_v1 = vpop.permute.xlu1 %2902 }
 0x847   : > { %2905 = vst.msk [vmem:[#allocation2 + $0x8] sm:$0xf] %vm2446_vm6, %v2903_v1 }
 0x84a   : > { %v2674_v3 = vpop.permute.xlu1 %2673 }
 0x84b   : > { %2676 = vst.msk [vmem:[#allocation2 + $0x4] sm:$0xf] %vm2446_vm6, %v2674_v3 }
 0x84e   : > { %v4709_v9 = vld [vmem:[#allocation2 + $0x8] ss:$0 sps:$4 sm:$0xff]  }
 0x84f   : > { %3490 = vmatmul.mubr.bf16.vlgmr.msra.gmra.mxu1 %v4709_v9 }
 0x850   : > { %4104 = vmatpush3.bf16.msra.mxu1 %v4710_v4 }
 0x851   : > { %4105 = vmatprep.subr.bf16.mxu1 %v4711_v10 }
 0x852   : > { %v2906_v6 = vld [vmem:[#allocation2] sm:$0xff] }
 0x853   : > { %v3905_v13 = vcombine.low %v2906_v6, %v2906_v6  ;;  %v3906_v14 = vcombine.high %v2906_v6, %v2906_v6 }
 0x854   : > { %4106 = vmatpush3.bf16.msra.mxu1 %v4714_v12 }
 0x855   : > { %3448 = vmatprep.mubr.bf16.mxu0 %v3906_v14  ;;  %3530 = vmatprep.mubr.bf16.mxu1 %v3906_v14 }
 0x856   : > { %3449 = vmatmul.mubr.bf16.vlgmr.msra.gmra.mxu0 %v3905_v13  ;;  %4107 = vmatprep.subr.bf16.mxu1 %v4716_v17 }
 0x857   : > { %4267 = vmatpush3.bf16.msra.mxu0 %v4715_v16  ;;  %4282 = vmatprep.mubr.msk.bf16.mxu0 %vm4839_vm0, %v4838_v11 }
 0x858   : > { %4268 = vmatprep.subr.bf16.mxu0 %v4838_v11  ;;  %4108 = vmatpush3.bf16.msra.mxu1 %v4717_v58 }
 0x859   : > { %4109 = vmatprep.subr.bf16.mxu1 %v4719_v18 }
 0x85b   : > { %4269 = vmatpush3.bf16.msra.mxu0 %v4718_v19 }
 0x85c   : > { %4270 = vmatprep.subr.bf16.mxu0 %v4838_v11  ;;  %4110 = vmatpush3.bf16.msra.mxu1 %v4720_v20 }
 0x85d   : > { %4111 = vmatprep.subr.bf16.mxu1 %v4722_v21 }
 0x85f   : > { %4271 = vmatpush3.bf16.msra.mxu0 %v4721_v22 }
 0x860   : > { %4272 = vmatprep.subr.bf16.mxu0 %v4838_v11  ;;  %4112 = vmatpush3.bf16.msra.mxu1 %v4723_v23 }
 0x861   : > { %4113 = vmatprep.subr.bf16.mxu1 %v4725_v25 }
 0x863   : > { %4273 = vmatpush3.bf16.msra.mxu0 %v4724_v26 }
 0x864   : > { %4274 = vmatprep.subr.bf16.mxu0 %v4838_v11  ;;  %4114 = vmatpush3.bf16.msra.mxu1 %v4726_v28 }
 0x865   : > { %4115 = vmatprep.subr.bf16.mxu1 %v4728_v29 }
 0x867   : > { %4275 = vmatpush3.bf16.msra.mxu0 %v4727_v30 }
 0x868   : > { %4276 = vmatprep.subr.bf16.mxu0 %v4838_v11  ;;  %4116 = vmatpush3.bf16.msra.mxu1 %v4729_v31 }
 0x869   : > { %4117 = vmatprep.subr.bf16.mxu1 %v4731_v32 }
 0x86b   : > { %4277 = vmatpush3.bf16.msra.mxu0 %v4730_v33 }
 0x86c   : > { %4278 = vmatprep.subr.bf16.mxu0 %v4838_v11  ;;  %4118 = vmatpush3.bf16.msra.mxu1 %v4732_v34 }
 0x86f   : > { %4279 = vmatpush3.bf16.msra.mxu0 %v4733_v7  ;;  %3531 = vmatmul.mubr.bf16.vlgmr.msra.gmra.mxu1 %v3905_v13 }
 0x870   : > { %4280 = vmatprep.subr.bf16.mxu0 %v4838_v11 }
 0x873   : > { %4281 = vmatpush3.bf16.msra.mxu0 %v4734_v27 }
 0x876   : > { %4283 = vmatmul.mubr.bf16.vlgmr.msra.gmra.mxu0 %v4709_v9 }
 0x90f   : > { %v3491_v54 = vpop.f32.mrf.mxu1 }
 0x911   : > { %v3493_v8 = vpop.f32.mrf.mxu1 }
 0x913   : > { %v3495_v52 = vpop.f32.mrf.mxu1 }
 0x915   : > { %v3496_v11 = vpop.f32.mrf.mxu1 }
 0x916   : > { %v3450_v40 = vpop.f32.mrf.mxu0 }
 0x917   : > { %v3451_v41 = vadd.f32 %v3450_v40, %v3009_v39 }
 0x918   : > { %v3452_v42 = vpop.f32.mrf.mxu0 }
 0x919   : > { %v3492_v43 = vadd.f32 %v3491_v54, %v3451_v41  ;;  %v3453_v44 = vadd.f32 %v3452_v42, %v3013_v15 }
 0x91a   : > { %v3454_v45 = vpop.f32.mrf.mxu0 }
 0x91b   : > { %3578 = vst [vmem:[%s258_s27] sm:$0xff] %v3492_v43  ;;  %v3494_v48 = vadd.f32 %v3493_v8, %v3453_v44 }
 0x91c   : > { %v3455_v24 = vpop.f32.mrf.mxu0 }
 0x91d   : > { %3579 = vst [vmem:[%s258_s27 + $0x8] sm:$0xff] %v3494_v48 }
 0x92f   : > { %v4119_v5 = vpop.f32.mrf.mxu1 }
 0x931   : > { %v4120_v50 = vpop.f32.mrf.mxu1 }
 0x932   : > { %v4121_v53 = vadd.f32 %v4120_v50, %v4119_v5 }
 0x933   : > { %v4122_v2 = vpop.f32.mrf.mxu1 }
 0x934   : > { %v3533_v55 = vadd.f32 %v4121_v53, %v3017_v49 }
 0x935   : > { %v4123_v57 = vpop.f32.mrf.mxu1 }
 0x936   : > { %v3572_v56 = vpop.f32.mrf.mxu0 }
 0x937   : > { %v3573_v59 = vadd.f32 %v3572_v56, %v3533_v55 }
 0x938   : > { %v4284_v51 = vpop.f32.mrf.mxu0 }
 0x939   : > { %3580 = vst [vmem:[%s258_s27 + $0x10] sm:$0xff] %v3573_v59 }
 0x93a   : > { %v3575_v46 = vpop.f32.mrf.mxu0 }
 0x93b   : > { %4772 = shalt.err (!%p4769_p5)
}
 0x93c   : > { %s4773_s17 = scalar_lea.hbm %s6049_s28, 384  ;;  %s4777_s20 = scalar_lea.hbm %s6103_s6, 768 }
 0x93d   : > { %p4774_p6 = scmp.ne.s32.totalorder %s6049_s28, %s4773_s17  ;;  %p4778_p10 = scmp.lt.s32.totalorder %s6049_s28, %s6103_s6 }
 0x93e   : > { %p4779_p11 = scmp.lt.s32.totalorder %s4777_s20, %s4773_s17 }
 0x93f   : > { %p4775_p7 = pnand %p4774_p6, %p4917_p4 }
 0x940   : > { %p4780_p12 = por %p4779_p11, %p4778_p10 }
 0x941   : > { %p4776_p9 = pneg %p4775_p7 }
 0x943   : > { %p4781_p13 = pnand %p4780_p12, %p4776_p9 }
 0x945   : > { %4784 = shalt.err (!%p4781_p13)
}
 0x946   : > { %4289 = dma.vmem_to_hbm [thread:$0]  (%p4917_p4), %s6051_s8, 384, %s6049_s28, %s3582_s24   ;;  %v4285_v60 = vpop.f32.mrf.mxu0 }
 0x947 PF: > { %p4295_p0 = scmp.ge.s32.totalorder %s4835_s26, 2  ;;  %s3610_s11 = sand.u32 1, %s4815_s21  }
 0x948   : > { %s3611_s12 = scalar_lea.sflag [#allocation4], %s3610_s11 }
 0x949   : > { %p4292_p1 = pnand %p4295_p0, %p4924_p8 }
 0x94b   : > { %p4293_p2 = pneg %p4292_p1 }
 0x94d   : > { %4810 = dma.done.wait (%p4293_p2), %s3611_s12, 384  }
 0x94e   : > { %4812 = vsyncadd (%p4293_p2), %s3611_s12, 4294966912  ;;  %s19_s26 = sadd.s32 1, %s4835_s26   ;;  %s6108_s21 = smov %s4819_s22 }
 0x94f   : > { %p16_p3 = scmp.ge.s32.totalorder %s19_s26, 4   ;;  %s6109_s22 = smov %s4823_s23 }
 0x950   : > { %s6110_s23 = smov %s4930_s10  ;;  %s6111_s24 = smov %s4831_s25 }
 0x951   : > { %s6112_s25 = smov %s6114_s29  ;;  %18 = sbr.rel (!%p16_p3) target bundleno = 4 (0x4), region = 79 }
 0x956   :  { %3616 = vsyncpa [#allocation4], 1 }
 0x957   :  { %3618 = vsyncpa [#allocation4 + $0x1], 1 }

</bundles_post_ra>
